<compile_context>
chip_gen: v5e
topology: v5e:2x2
jax: 0.10.0
libtpu: 0.0.40
codegen_flags: <defaults>
</compile_context>

<pallas_src>
import functools
import math

import jax
import jax.numpy as jnp
from jax.experimental import pallas as pl
from jax.experimental.pallas import tpu as pltpu


# ----------------------------------------------------------------------------
# Fused whole-forward kernel (one grid step == one batch element)
# ----------------------------------------------------------------------------

def _encoder_kernel(
    x_ref, emb_w_ref, emb_b_ref,
    wqkv_ref, bqkv_ref, wo_ref, bo_ref, ln1_g_ref, ln1_b_ref,
    w1_ref, b1_ref, w2_ref, b2_ref, ln2_g_ref, ln2_b_ref,
    fc_w_ref, fc_b_ref,
    out_ref, attn_ref,
    *, n_layers, n_heads, d_k, eps):
  f32 = jnp.float32
  scale = 1.0 / math.sqrt(d_k)
  hdk = n_heads * d_k

  def layer_norm(v, g, b):
    mu = jnp.mean(v, axis=-1, keepdims=True)
    var = jnp.mean(jnp.square(v - mu), axis=-1, keepdims=True)
    return (v - mu) * jax.lax.rsqrt(var + eps) * g + b

  # --- Embedding: (S, d_obs) @ (d_obs, d_embed) ---
  y = jnp.dot(x_ref[0], emb_w_ref[...],
              preferred_element_type=f32) + emb_b_ref[...]

  # --- Encoder layers (statically unrolled; activations stay VMEM-resident) ---
  for l in range(n_layers):
    # Fused QKV projection: single MXU pass, lane-dense (3*h*dk)-wide output.
    qkv = jnp.dot(y, wqkv_ref[l], preferred_element_type=f32) + bqkv_ref[l]
    q = qkv[:, 0:hdk]
    k = qkv[:, hdk:2 * hdk]
    v = qkv[:, 2 * hdk:3 * hdk]

    wo_l = wo_ref[l]                       # (h*dk, d_embed), loaded once / layer

    # All heads handled inside this one invocation (unrolled, static slices).
    mha = bo_ref[l]                        # (1, d_embed) bias, broadcasts below
    for h in range(n_heads):
      lo, hi = h * d_k, (h + 1) * d_k
      qh, kh, vh = q[:, lo:hi], k[:, lo:hi], v[:, lo:hi]
      s = jnp.dot(qh, kh.T, preferred_element_type=f32) * scale     # (S, S)
      m = jnp.max(s, axis=-1, keepdims=True)
      e = jnp.exp(s - m)
      denom = jnp.sum(e, axis=-1, keepdims=True)
      p = e * pl.reciprocal(denom, approx=True)                     # EUP slot
      attn_ref[l, 0, h] = p.astype(attn_ref.dtype)
      ctx_h = jnp.dot(p, vh, preferred_element_type=f32)            # (S, d_k)
      # ctx @ W_O == sum_h ctx_h @ W_O[h*d_k:(h+1)*d_k]  (no lane concat needed)
      mha = mha + jnp.dot(ctx_h, wo_l[lo:hi, :], preferred_element_type=f32)

    y = layer_norm(mha + y, ln1_g_ref[l], ln1_b_ref[l])

    # Position-wise FFN (Conv1d k=1 == per-position Linear over features).
    f = jnp.maximum(
        jnp.dot(y, w1_ref[l], preferred_element_type=f32) + b1_ref[l], 0.0)
    f = jnp.dot(f, w2_ref[l], preferred_element_type=f32) + b2_ref[l]
    y = layer_norm(f + y, ln2_g_ref[l], ln2_b_ref[l])

  # --- Classifier head: mean over sequence -> fc -> log_softmax ---
  m = jnp.mean(y, axis=0, keepdims=True)                            # (1, d_embed)
  logits = jnp.dot(m, fc_w_ref[...], preferred_element_type=f32) + fc_b_ref[...]
  z = logits - jnp.max(logits, axis=-1, keepdims=True)
  lse = jnp.log(jnp.sum(jnp.exp(z), axis=-1, keepdims=True))
  out_ref[0] = (z - lse).astype(out_ref.dtype)


def _full_spec(shape):
  zeros = (0,) * len(shape)
  return pl.BlockSpec(shape, lambda b, _z=zeros: _z)


# ----------------------------------------------------------------------------
# Forward wrapper: packs params and issues the single fused pallas_call
# ----------------------------------------------------------------------------

def encoder_forward(x, params):
  B, S, d_obs = x.shape
  d_embed = params["emb_w"].shape[1]
  d_class = params["fc_w"].shape[1]
  layers = params["layers"]
  L = len(layers)
  n_heads = layers[0]["n_heads"]
  d_k = layers[0]["d_k"]
  hdk = n_heads * d_k
  d_hidden = layers[0]["w1"].shape[1]

  # Pack per-layer weights: fused W_Q|W_K|W_V and a leading layer axis so the
  # whole forward runs as ONE pallas_call (weight blocks are grid-invariant).
  wqkv = jnp.stack(
      [jnp.concatenate([lp["wq"], lp["wk"], lp["wv"]], axis=1) for lp in layers])
  bqkv = jnp.stack(
      [jnp.concatenate([lp["bq"], lp["bk"], lp["bv"]])[None, :] for lp in layers])
  wo = jnp.stack([lp["wo"] for lp in layers])
  bo = jnp.stack([lp["bo"][None, :] for lp in layers])
  ln1_g = jnp.stack([lp["ln1_g"][None, :] for lp in layers])
  ln1_b = jnp.stack([lp["ln1_b"][None, :] for lp in layers])
  w1 = jnp.stack([lp["w1"] for lp in layers])
  b1 = jnp.stack([lp["b1"][None, :] for lp in layers])
  w2 = jnp.stack([lp["w2"] for lp in layers])
  b2 = jnp.stack([lp["b2"][None, :] for lp in layers])
  ln2_g = jnp.stack([lp["ln2_g"][None, :] for lp in layers])
  ln2_b = jnp.stack([lp["ln2_b"][None, :] for lp in layers])
  emb_b = params["emb_b"][None, :]
  fc_b = params["fc_b"][None, :]

  kernel = functools.partial(
      _encoder_kernel, n_layers=L, n_heads=n_heads, d_k=d_k, eps=1e-5)

  out3, attn_all = pl.pallas_call(
      kernel,
      out_shape=(
          jax.ShapeDtypeStruct((B, 1, d_class), jnp.float32),
          jax.ShapeDtypeStruct((L, B, n_heads, S, S), jnp.float32),
      ),
      grid=(B,),
      in_specs=[
          pl.BlockSpec((1, S, d_obs), lambda b: (b, 0, 0)),
          _full_spec((d_obs, d_embed)),
          _full_spec((1, d_embed)),
          _full_spec((L, d_embed, 3 * hdk)),
          _full_spec((L, 1, 3 * hdk)),
          _full_spec((L, hdk, d_embed)),
          _full_spec((L, 1, d_embed)),
          _full_spec((L, 1, d_embed)),
          _full_spec((L, 1, d_embed)),
          _full_spec((L, d_embed, d_hidden)),
          _full_spec((L, 1, d_hidden)),
          _full_spec((L, d_hidden, d_embed)),
          _full_spec((L, 1, d_embed)),
          _full_spec((L, 1, d_embed)),
          _full_spec((L, 1, d_embed)),
          _full_spec((d_embed, d_class)),
          _full_spec((1, d_class)),
      ],
      out_specs=(
          pl.BlockSpec((1, 1, d_class), lambda b: (b, 0, 0)),
          pl.BlockSpec((L, 1, n_heads, S, S), lambda b: (0, b, 0, 0, 0)),
      ),
      compiler_params=pltpu.CompilerParams(
          dimension_semantics=("parallel",)),   # v7x: one batch element per TC
  )(x, params["emb_w"], emb_b, wqkv, bqkv, wo, bo, ln1_g, ln1_b,
    w1, b1, w2, b2, ln2_g, ln2_b, params["fc_w"], fc_b)

  out = out3.reshape(B, d_class)
  attentions = [attn_all[i] for i in range(L)]
  return out, attentions


# ----------------------------------------------------------------------------
# Pure-JAX reference (same math) for a correctness check
# ----------------------------------------------------------------------------

def encoder_reference(x, params):
  def ln(v, g, b, eps=1e-5):
    mu = v.mean(-1, keepdims=True)
    var = ((v - mu) ** 2).mean(-1, keepdims=True)
    return (v - mu) / jnp.sqrt(var + eps) * g + b

  B, S, _ = x.shape
  y = x @ params["emb_w"] + params["emb_b"]
  attns = []
  for lp in params["layers"]:
    h, dk = lp["n_heads"], lp["d_k"]
    q = (y @ lp["wq"] + lp["bq"]).reshape(B, S, h, dk).transpose(0, 2, 1, 3)
    k = (y @ lp["wk"] + lp["bk"]).reshape(B, S, h, dk).transpose(0, 2, 1, 3)
    v = (y @ lp["wv"] + lp["bv"]).reshape(B, S, h, dk).transpose(0, 2, 1, 3)
    scores = q @ k.transpose(0, 1, 3, 2) / math.sqrt(dk)
    attn = jax.nn.softmax(scores, axis=-1)
    ctx = (attn @ v).transpose(0, 2, 1, 3).reshape(B, S, h * dk)
    out = ctx @ lp["wo"] + lp["bo"]
    y = ln(out + y, lp["ln1_g"], lp["ln1_b"])
    f = jnp.maximum(y @ lp["w1"] + lp["b1"], 0.0) @ lp["w2"] + lp["b2"]
    y = ln(f + y, lp["ln2_g"], lp["ln2_b"])
    attns.append(attn)
  m = y.mean(axis=1)
  logits = m @ params["fc_w"] + params["fc_b"]
  return jax.nn.log_softmax(logits, axis=-1), attns


# ----------------------------------------------------------------------------
# Deterministic parameter init
# ----------------------------------------------------------------------------

def init_params(key, d_obs, d_embed, d_class, d_k, d_hidden, n_heads, n_layers):
  def dense(k, din, dout, scale=0.1):
    kw, kb = jax.random.split(k)
    return (scale * jax.random.normal(kw, (din, dout), jnp.float32),
            scale * jax.random.normal(kb, (dout,), jnp.float32))

  keys = jax.random.split(key, 2 + n_layers)
  emb_w, emb_b = dense(keys[0], d_obs, d_embed)
  fc_w, fc_b = dense(keys[1], d_embed, d_class)
  layers = []
  for li in range(n_layers):
    ks = jax.random.split(keys[2 + li], 6)
    wq, bq = dense(ks[0], d_embed, d_k * n_heads)
    wk, bk = dense(ks[1], d_embed, d_k * n_heads)
    wv, bv = dense(ks[2], d_embed, d_k * n_heads)
    wo, bo = dense(ks[3], n_heads * d_k, d_embed)
    w1, b1 = dense(ks[4], d_embed, d_hidden)
    w2, b2 = dense(ks[5], d_hidden, d_embed)
    layers.append(dict(
        n_heads=n_heads, d_k=d_k,
        wq=wq, bq=bq, wk=wk, bk=bk, wv=wv, bv=bv, wo=wo, bo=bo,
        ln1_g=jnp.ones((d_embed,), jnp.float32),
        ln1_b=jnp.zeros((d_embed,), jnp.float32),
        w1=w1, b1=b1, w2=w2, b2=b2,
        ln2_g=jnp.ones((d_embed,), jnp.float32),
        ln2_b=jnp.zeros((d_embed,), jnp.float32),
    ))
  return dict(emb_w=emb_w, emb_b=emb_b, fc_w=fc_w, fc_b=fc_b, layers=layers)


# ----------------------------------------------------------------------------
# Main
# ----------------------------------------------------------------------------

if __name__ == "__main__":
  B, S = 2, 8
  d_obs, d_embed, d_class = 6, 32, 5
  d_k, d_hidden, n_heads, n_layers = 8, 64, 4, 2

  key = jax.random.PRNGKey(0)
  kx, kp = jax.random.split(key)
  x = jax.random.normal(kx, (B, S, d_obs), jnp.float32)
  params = init_params(kp, d_obs, d_embed, d_class, d_k, d_hidden,
                       n_heads, n_layers)

  out, attentions = encoder_forward(x, params)
  out = jax.block_until_ready(out)
  attentions = [jax.block_until_ready(a) for a in attentions]

  ref_out, ref_attns = encoder_reference(x, params)
  assert out.shape == (B, d_class)
  assert all(a.shape == (B, n_heads, S, S) for a in attentions)
  # Tolerance accounts for the EUP approximate-reciprocal in the softmax denom.
  assert jnp.allclose(out, ref_out, rtol=2e-3, atol=2e-3)
  for a, ra in zip(attentions, ref_attns):
    assert jnp.allclose(a, ra, rtol=2e-3, atol=2e-3)

  print("KERNEL_OK")
</pallas_src>

<mosaic_0001>
module attributes {stable_mosaic.version = 11 : i64} {
  func.func @_encoder_kernel(%arg0: i32, %arg1: memref<1x8x6xf32, #tpu.memory_space<vmem>>, %arg2: memref<6x32xf32, #tpu.memory_space<vmem>>, %arg3: memref<1x32xf32, #tpu.memory_space<vmem>>, %arg4: memref<2x32x96xf32, #tpu.memory_space<vmem>>, %arg5: memref<2x1x96xf32, #tpu.memory_space<vmem>>, %arg6: memref<2x32x32xf32, #tpu.memory_space<vmem>>, %arg7: memref<2x1x32xf32, #tpu.memory_space<vmem>>, %arg8: memref<2x1x32xf32, #tpu.memory_space<vmem>>, %arg9: memref<2x1x32xf32, #tpu.memory_space<vmem>>, %arg10: memref<2x32x64xf32, #tpu.memory_space<vmem>>, %arg11: memref<2x1x64xf32, #tpu.memory_space<vmem>>, %arg12: memref<2x64x32xf32, #tpu.memory_space<vmem>>, %arg13: memref<2x1x32xf32, #tpu.memory_space<vmem>>, %arg14: memref<2x1x32xf32, #tpu.memory_space<vmem>>, %arg15: memref<2x1x32xf32, #tpu.memory_space<vmem>>, %arg16: memref<32x5xf32, #tpu.memory_space<vmem>>, %arg17: memref<1x5xf32, #tpu.memory_space<vmem>>, %arg18: memref<1x1x5xf32, #tpu.memory_space<vmem>>, %arg19: memref<2x1x4x8x8xf32, #tpu.memory_space<vmem>>) attributes {dimension_semantics = [#tpu.dimension_semantics<parallel>], iteration_bounds = array<i64: 2>, scalar_prefetch = 0 : i64, scratch_operands = 0 : i64, tpu.core_type = #tpu.core_type<tc>, window_params = [{transform_indices = @transform_0, window_bounds = array<i64: 1, 8, 6>}, {pipeline_mode = #tpu.pipeline_mode<synchronous>, transform_indices = @transform_1, window_bounds = array<i64: 6, 32>}, {pipeline_mode = #tpu.pipeline_mode<synchronous>, transform_indices = @transform_2, window_bounds = array<i64: 1, 32>}, {pipeline_mode = #tpu.pipeline_mode<synchronous>, transform_indices = @transform_3, window_bounds = array<i64: 2, 32, 96>}, {pipeline_mode = #tpu.pipeline_mode<synchronous>, transform_indices = @transform_4, window_bounds = array<i64: 2, 1, 96>}, {pipeline_mode = #tpu.pipeline_mode<synchronous>, transform_indices = @transform_5, window_bounds = array<i64: 2, 32, 32>}, {pipeline_mode = #tpu.pipeline_mode<synchronous>, transform_indices = @transform_6, window_bounds = array<i64: 2, 1, 32>}, {pipeline_mode = #tpu.pipeline_mode<synchronous>, transform_indices = @transform_7, window_bounds = array<i64: 2, 1, 32>}, {pipeline_mode = #tpu.pipeline_mode<synchronous>, transform_indices = @transform_8, window_bounds = array<i64: 2, 1, 32>}, {pipeline_mode = #tpu.pipeline_mode<synchronous>, transform_indices = @transform_9, window_bounds = array<i64: 2, 32, 64>}, {pipeline_mode = #tpu.pipeline_mode<synchronous>, transform_indices = @transform_10, window_bounds = array<i64: 2, 1, 64>}, {pipeline_mode = #tpu.pipeline_mode<synchronous>, transform_indices = @transform_11, window_bounds = array<i64: 2, 64, 32>}, {pipeline_mode = #tpu.pipeline_mode<synchronous>, transform_indices = @transform_12, window_bounds = array<i64: 2, 1, 32>}, {pipeline_mode = #tpu.pipeline_mode<synchronous>, transform_indices = @transform_13, window_bounds = array<i64: 2, 1, 32>}, {pipeline_mode = #tpu.pipeline_mode<synchronous>, transform_indices = @transform_14, window_bounds = array<i64: 2, 1, 32>}, {pipeline_mode = #tpu.pipeline_mode<synchronous>, transform_indices = @transform_15, window_bounds = array<i64: 32, 5>}, {pipeline_mode = #tpu.pipeline_mode<synchronous>, transform_indices = @transform_16, window_bounds = array<i64: 1, 5>}, {transform_indices = @transform_17, window_bounds = array<i64: 1, 1, 5>}, {transform_indices = @transform_18, window_bounds = array<i64: 2, 1, 4, 8, 8>}]} {
    %c0 = arith.constant 0 : index
    %c0_0 = arith.constant 0 : index
    %c0_1 = arith.constant 0 : index
    %0 = vector.load %arg1[%c0, %c0_0, %c0_1] : memref<1x8x6xf32, #tpu.memory_space<vmem>>, vector<1x8x6xf32>
    %1 = vector.shape_cast %0 : vector<1x8x6xf32> to vector<8x6xf32>
    %c0_2 = arith.constant 0 : index
    %c0_3 = arith.constant 0 : index
    %2 = vector.load %arg2[%c0_2, %c0_3] : memref<6x32xf32, #tpu.memory_space<vmem>>, vector<6x32xf32>
    %cst = arith.constant dense<0.000000e+00> : vector<8x32xf32>
    %3 = tpu.matmul %1, %2, %cst {dimension_numbers = #tpu.dot_dimension_numbers<[1], [0], [0], [1], [0, 0, 1, 1], [], []>} : vector<8x6xf32>, vector<6x32xf32>, vector<8x32xf32> -> vector<8x32xf32>
    %c0_4 = arith.constant 0 : index
    %c0_5 = arith.constant 0 : index
    %4 = vector.load %arg3[%c0_4, %c0_5] : memref<1x32xf32, #tpu.memory_space<vmem>>, vector<1x32xf32>
    %5 = vector.broadcast %4 : vector<1x32xf32> to vector<8x32xf32>
    %6 = arith.addf %3, %5 : vector<8x32xf32>
    %c0_6 = arith.constant 0 : index
    %c0_7 = arith.constant 0 : index
    %c0_8 = arith.constant 0 : index
    %7 = vector.load %arg4[%c0_6, %c0_7, %c0_8] : memref<2x32x96xf32, #tpu.memory_space<vmem>>, vector<1x32x96xf32>
    %8 = vector.shape_cast %7 : vector<1x32x96xf32> to vector<32x96xf32>
    %cst_9 = arith.constant dense<0.000000e+00> : vector<8x96xf32>
    %9 = tpu.matmul %6, %8, %cst_9 {dimension_numbers = #tpu.dot_dimension_numbers<[1], [0], [0], [1], [0, 0, 1, 1], [], []>} : vector<8x32xf32>, vector<32x96xf32>, vector<8x96xf32> -> vector<8x96xf32>
    %c0_10 = arith.constant 0 : index
    %c0_11 = arith.constant 0 : index
    %c0_12 = arith.constant 0 : index
    %10 = vector.load %arg5[%c0_10, %c0_11, %c0_12] : memref<2x1x96xf32, #tpu.memory_space<vmem>>, vector<1x1x96xf32>
    %11 = vector.shape_cast %10 : vector<1x1x96xf32> to vector<1x96xf32>
    %12 = vector.broadcast %11 : vector<1x96xf32> to vector<8x96xf32>
    %13 = arith.addf %9, %12 : vector<8x96xf32>
    %14 = vector.extract_strided_slice %13 {offsets = [0, 0], sizes = [8, 32], strides = [1, 1]} : vector<8x96xf32> to vector<8x32xf32>
    %15 = vector.extract_strided_slice %13 {offsets = [0, 32], sizes = [8, 32], strides = [1, 1]} : vector<8x96xf32> to vector<8x32xf32>
    %16 = vector.extract_strided_slice %13 {offsets = [0, 64], sizes = [8, 32], strides = [1, 1]} : vector<8x96xf32> to vector<8x32xf32>
    %c0_13 = arith.constant 0 : index
    %c0_14 = arith.constant 0 : index
    %c0_15 = arith.constant 0 : index
    %17 = vector.load %arg6[%c0_13, %c0_14, %c0_15] : memref<2x32x32xf32, #tpu.memory_space<vmem>>, vector<1x32x32xf32>
    %18 = vector.shape_cast %17 : vector<1x32x32xf32> to vector<32x32xf32>
    %c0_16 = arith.constant 0 : index
    %c0_17 = arith.constant 0 : index
    %c0_18 = arith.constant 0 : index
    %19 = vector.load %arg7[%c0_16, %c0_17, %c0_18] : memref<2x1x32xf32, #tpu.memory_space<vmem>>, vector<1x1x32xf32>
    %20 = vector.shape_cast %19 : vector<1x1x32xf32> to vector<1x32xf32>
    %21 = vector.extract_strided_slice %14 {offsets = [0, 0], sizes = [8, 8], strides = [1, 1]} : vector<8x32xf32> to vector<8x8xf32>
    %22 = vector.extract_strided_slice %15 {offsets = [0, 0], sizes = [8, 8], strides = [1, 1]} : vector<8x32xf32> to vector<8x8xf32>
    %23 = vector.extract_strided_slice %16 {offsets = [0, 0], sizes = [8, 8], strides = [1, 1]} : vector<8x32xf32> to vector<8x8xf32>
    %24 = tpu.transpose %22, [1, 0] : vector<8x8xf32> -> vector<8x8xf32>
    %cst_19 = arith.constant dense<0.000000e+00> : vector<8x8xf32>
    %25 = tpu.matmul %21, %24, %cst_19 {dimension_numbers = #tpu.dot_dimension_numbers<[1], [0], [0], [1], [0, 0, 1, 1], [], []>} : vector<8x8xf32>, vector<8x8xf32>, vector<8x8xf32> -> vector<8x8xf32>
    %cst_20 = arith.constant 0.353553385 : f32
    %26 = vector.broadcast %cst_20 : f32 to vector<8x8xf32>
    %27 = arith.mulf %25, %26 : vector<8x8xf32>
    %cst_21 = arith.constant dense<0xFF800000> : vector<8xf32>
    %28 = vector.multi_reduction <maximumf>, %27, %cst_21 [1] : vector<8x8xf32> to vector<8xf32>
    %29 = vector.shape_cast %28 : vector<8xf32> to vector<8x1xf32>
    %30 = vector.broadcast %29 : vector<8x1xf32> to vector<8x8xf32>
    %31 = arith.subf %27, %30 : vector<8x8xf32>
    %32 = math.exp %31 : vector<8x8xf32>
    %cst_22 = arith.constant dense<0.000000e+00> : vector<8xf32>
    %33 = vector.multi_reduction <add>, %32, %cst_22 [1] : vector<8x8xf32> to vector<8xf32>
    %34 = vector.shape_cast %33 : vector<8xf32> to vector<8x1xf32>
    %35 = tpu.reciprocal %34 {approx = true} : vector<8x1xf32> -> vector<8x1xf32>
    %36 = vector.broadcast %35 : vector<8x1xf32> to vector<8x8xf32>
    %37 = arith.mulf %32, %36 : vector<8x8xf32>
    %c0_23 = arith.constant 0 : index
    %c0_24 = arith.constant 0 : index
    %c0_25 = arith.constant 0 : index
    %c0_26 = arith.constant 0 : index
    %c0_27 = arith.constant 0 : index
    %38 = vector.load %arg19[%c0_23, %c0_24, %c0_25, %c0_26, %c0_27] : memref<2x1x4x8x8xf32, #tpu.memory_space<vmem>>, vector<1x1x1x8x8xf32>
    %39 = vector.shape_cast %38 : vector<1x1x1x8x8xf32> to vector<8x8xf32>
    %40 = vector.shape_cast %37 : vector<8x8xf32> to vector<1x1x1x8x8xf32>
    tpu.vector_store %arg19[%c0_23, %c0_24, %c0_25, %c0_26, %c0_27], %40 {strides = array<i32>} : memref<2x1x4x8x8xf32, #tpu.memory_space<vmem>>, vector<1x1x1x8x8xf32>,
    %cst_28 = arith.constant dense<0.000000e+00> : vector<8x8xf32>
    %41 = tpu.matmul %37, %23, %cst_28 {dimension_numbers = #tpu.dot_dimension_numbers<[1], [0], [0], [1], [0, 0, 1, 1], [], []>} : vector<8x8xf32>, vector<8x8xf32>, vector<8x8xf32> -> vector<8x8xf32>
    %42 = vector.extract_strided_slice %18 {offsets = [0, 0], sizes = [8, 32], strides = [1, 1]} : vector<32x32xf32> to vector<8x32xf32>
    %cst_29 = arith.constant dense<0.000000e+00> : vector<8x32xf32>
    %43 = tpu.matmul %41, %42, %cst_29 {dimension_numbers = #tpu.dot_dimension_numbers<[1], [0], [0], [1], [0, 0, 1, 1], [], []>} : vector<8x8xf32>, vector<8x32xf32>, vector<8x32xf32> -> vector<8x32xf32>
    %44 = vector.broadcast %20 : vector<1x32xf32> to vector<8x32xf32>
    %45 = arith.addf %44, %43 : vector<8x32xf32>
    %46 = vector.extract_strided_slice %14 {offsets = [0, 8], sizes = [8, 8], strides = [1, 1]} : vector<8x32xf32> to vector<8x8xf32>
    %47 = vector.extract_strided_slice %15 {offsets = [0, 8], sizes = [8, 8], strides = [1, 1]} : vector<8x32xf32> to vector<8x8xf32>
    %48 = vector.extract_strided_slice %16 {offsets = [0, 8], sizes = [8, 8], strides = [1, 1]} : vector<8x32xf32> to vector<8x8xf32>
    %49 = tpu.transpose %47, [1, 0] : vector<8x8xf32> -> vector<8x8xf32>
    %cst_30 = arith.constant dense<0.000000e+00> : vector<8x8xf32>
    %50 = tpu.matmul %46, %49, %cst_30 {dimension_numbers = #tpu.dot_dimension_numbers<[1], [0], [0], [1], [0, 0, 1, 1], [], []>} : vector<8x8xf32>, vector<8x8xf32>, vector<8x8xf32> -> vector<8x8xf32>
    %cst_31 = arith.constant 0.353553385 : f32
    %51 = vector.broadcast %cst_31 : f32 to vector<8x8xf32>
    %52 = arith.mulf %50, %51 : vector<8x8xf32>
    %cst_32 = arith.constant dense<0xFF800000> : vector<8xf32>
    %53 = vector.multi_reduction <maximumf>, %52, %cst_32 [1] : vector<8x8xf32> to vector<8xf32>
    %54 = vector.shape_cast %53 : vector<8xf32> to vector<8x1xf32>
    %55 = vector.broadcast %54 : vector<8x1xf32> to vector<8x8xf32>
    %56 = arith.subf %52, %55 : vector<8x8xf32>
    %57 = math.exp %56 : vector<8x8xf32>
    %cst_33 = arith.constant dense<0.000000e+00> : vector<8xf32>
    %58 = vector.multi_reduction <add>, %57, %cst_33 [1] : vector<8x8xf32> to vector<8xf32>
    %59 = vector.shape_cast %58 : vector<8xf32> to vector<8x1xf32>
    %60 = tpu.reciprocal %59 {approx = true} : vector<8x1xf32> -> vector<8x1xf32>
    %61 = vector.broadcast %60 : vector<8x1xf32> to vector<8x8xf32>
    %62 = arith.mulf %57, %61 : vector<8x8xf32>
    %c0_34 = arith.constant 0 : index
    %c0_35 = arith.constant 0 : index
    %c1 = arith.constant 1 : index
    %c0_36 = arith.constant 0 : index
    %c0_37 = arith.constant 0 : index
    %63 = vector.load %arg19[%c0_34, %c0_35, %c1, %c0_36, %c0_37] : memref<2x1x4x8x8xf32, #tpu.memory_space<vmem>>, vector<1x1x1x8x8xf32>
    %64 = vector.shape_cast %63 : vector<1x1x1x8x8xf32> to vector<8x8xf32>
    %65 = vector.shape_cast %62 : vector<8x8xf32> to vector<1x1x1x8x8xf32>
    tpu.vector_store %arg19[%c0_34, %c0_35, %c1, %c0_36, %c0_37], %65 {strides = array<i32>} : memref<2x1x4x8x8xf32, #tpu.memory_space<vmem>>, vector<1x1x1x8x8xf32>,
    %cst_38 = arith.constant dense<0.000000e+00> : vector<8x8xf32>
    %66 = tpu.matmul %62, %48, %cst_38 {dimension_numbers = #tpu.dot_dimension_numbers<[1], [0], [0], [1], [0, 0, 1, 1], [], []>} : vector<8x8xf32>, vector<8x8xf32>, vector<8x8xf32> -> vector<8x8xf32>
    %67 = vector.extract_strided_slice %18 {offsets = [8, 0], sizes = [8, 32], strides = [1, 1]} : vector<32x32xf32> to vector<8x32xf32>
    %cst_39 = arith.constant dense<0.000000e+00> : vector<8x32xf32>
    %68 = tpu.matmul %66, %67, %cst_39 {dimension_numbers = #tpu.dot_dimension_numbers<[1], [0], [0], [1], [0, 0, 1, 1], [], []>} : vector<8x8xf32>, vector<8x32xf32>, vector<8x32xf32> -> vector<8x32xf32>
    %69 = arith.addf %45, %68 : vector<8x32xf32>
    %70 = vector.extract_strided_slice %14 {offsets = [0, 16], sizes = [8, 8], strides = [1, 1]} : vector<8x32xf32> to vector<8x8xf32>
    %71 = vector.extract_strided_slice %15 {offsets = [0, 16], sizes = [8, 8], strides = [1, 1]} : vector<8x32xf32> to vector<8x8xf32>
    %72 = vector.extract_strided_slice %16 {offsets = [0, 16], sizes = [8, 8], strides = [1, 1]} : vector<8x32xf32> to vector<8x8xf32>
    %73 = tpu.transpose %71, [1, 0] : vector<8x8xf32> -> vector<8x8xf32>
    %cst_40 = arith.constant dense<0.000000e+00> : vector<8x8xf32>
    %74 = tpu.matmul %70, %73, %cst_40 {dimension_numbers = #tpu.dot_dimension_numbers<[1], [0], [0], [1], [0, 0, 1, 1], [], []>} : vector<8x8xf32>, vector<8x8xf32>, vector<8x8xf32> -> vector<8x8xf32>
    %cst_41 = arith.constant 0.353553385 : f32
    %75 = vector.broadcast %cst_41 : f32 to vector<8x8xf32>
    %76 = arith.mulf %74, %75 : vector<8x8xf32>
    %cst_42 = arith.constant dense<0xFF800000> : vector<8xf32>
    %77 = vector.multi_reduction <maximumf>, %76, %cst_42 [1] : vector<8x8xf32> to vector<8xf32>
    %78 = vector.shape_cast %77 : vector<8xf32> to vector<8x1xf32>
    %79 = vector.broadcast %78 : vector<8x1xf32> to vector<8x8xf32>
    %80 = arith.subf %76, %79 : vector<8x8xf32>
    %81 = math.exp %80 : vector<8x8xf32>
    %cst_43 = arith.constant dense<0.000000e+00> : vector<8xf32>
    %82 = vector.multi_reduction <add>, %81, %cst_43 [1] : vector<8x8xf32> to vector<8xf32>
    %83 = vector.shape_cast %82 : vector<8xf32> to vector<8x1xf32>
    %84 = tpu.reciprocal %83 {approx = true} : vector<8x1xf32> -> vector<8x1xf32>
    %85 = vector.broadcast %84 : vector<8x1xf32> to vector<8x8xf32>
    %86 = arith.mulf %81, %85 : vector<8x8xf32>
    %c0_44 = arith.constant 0 : index
    %c0_45 = arith.constant 0 : index
    %c2 = arith.constant 2 : index
    %c0_46 = arith.constant 0 : index
    %c0_47 = arith.constant 0 : index
    %87 = vector.load %arg19[%c0_44, %c0_45, %c2, %c0_46, %c0_47] : memref<2x1x4x8x8xf32, #tpu.memory_space<vmem>>, vector<1x1x1x8x8xf32>
    %88 = vector.shape_cast %87 : vector<1x1x1x8x8xf32> to vector<8x8xf32>
    %89 = vector.shape_cast %86 : vector<8x8xf32> to vector<1x1x1x8x8xf32>
    tpu.vector_store %arg19[%c0_44, %c0_45, %c2, %c0_46, %c0_47], %89 {strides = array<i32>} : memref<2x1x4x8x8xf32, #tpu.memory_space<vmem>>, vector<1x1x1x8x8xf32>,
    %cst_48 = arith.constant dense<0.000000e+00> : vector<8x8xf32>
    %90 = tpu.matmul %86, %72, %cst_48 {dimension_numbers = #tpu.dot_dimension_numbers<[1], [0], [0], [1], [0, 0, 1, 1], [], []>} : vector<8x8xf32>, vector<8x8xf32>, vector<8x8xf32> -> vector<8x8xf32>
    %91 = vector.extract_strided_slice %18 {offsets = [16, 0], sizes = [8, 32], strides = [1, 1]} : vector<32x32xf32> to vector<8x32xf32>
    %cst_49 = arith.constant dense<0.000000e+00> : vector<8x32xf32>
    %92 = tpu.matmul %90, %91, %cst_49 {dimension_numbers = #tpu.dot_dimension_numbers<[1], [0], [0], [1], [0, 0, 1, 1], [], []>} : vector<8x8xf32>, vector<8x32xf32>, vector<8x32xf32> -> vector<8x32xf32>
    %93 = arith.addf %69, %92 : vector<8x32xf32>
    %94 = vector.extract_strided_slice %14 {offsets = [0, 24], sizes = [8, 8], strides = [1, 1]} : vector<8x32xf32> to vector<8x8xf32>
    %95 = vector.extract_strided_slice %15 {offsets = [0, 24], sizes = [8, 8], strides = [1, 1]} : vector<8x32xf32> to vector<8x8xf32>
    %96 = vector.extract_strided_slice %16 {offsets = [0, 24], sizes = [8, 8], strides = [1, 1]} : vector<8x32xf32> to vector<8x8xf32>
    %97 = tpu.transpose %95, [1, 0] : vector<8x8xf32> -> vector<8x8xf32>
    %cst_50 = arith.constant dense<0.000000e+00> : vector<8x8xf32>
    %98 = tpu.matmul %94, %97, %cst_50 {dimension_numbers = #tpu.dot_dimension_numbers<[1], [0], [0], [1], [0, 0, 1, 1], [], []>} : vector<8x8xf32>, vector<8x8xf32>, vector<8x8xf32> -> vector<8x8xf32>
    %cst_51 = arith.constant 0.353553385 : f32
    %99 = vector.broadcast %cst_51 : f32 to vector<8x8xf32>
    %100 = arith.mulf %98, %99 : vector<8x8xf32>
    %cst_52 = arith.constant dense<0xFF800000> : vector<8xf32>
    %101 = vector.multi_reduction <maximumf>, %100, %cst_52 [1] : vector<8x8xf32> to vector<8xf32>
    %102 = vector.shape_cast %101 : vector<8xf32> to vector<8x1xf32>
    %103 = vector.broadcast %102 : vector<8x1xf32> to vector<8x8xf32>
    %104 = arith.subf %100, %103 : vector<8x8xf32>
    %105 = math.exp %104 : vector<8x8xf32>
    %cst_53 = arith.constant dense<0.000000e+00> : vector<8xf32>
    %106 = vector.multi_reduction <add>, %105, %cst_53 [1] : vector<8x8xf32> to vector<8xf32>
    %107 = vector.shape_cast %106 : vector<8xf32> to vector<8x1xf32>
    %108 = tpu.reciprocal %107 {approx = true} : vector<8x1xf32> -> vector<8x1xf32>
    %109 = vector.broadcast %108 : vector<8x1xf32> to vector<8x8xf32>
    %110 = arith.mulf %105, %109 : vector<8x8xf32>
    %c0_54 = arith.constant 0 : index
    %c0_55 = arith.constant 0 : index
    %c3 = arith.constant 3 : index
    %c0_56 = arith.constant 0 : index
    %c0_57 = arith.constant 0 : index
    %111 = vector.load %arg19[%c0_54, %c0_55, %c3, %c0_56, %c0_57] : memref<2x1x4x8x8xf32, #tpu.memory_space<vmem>>, vector<1x1x1x8x8xf32>
    %112 = vector.shape_cast %111 : vector<1x1x1x8x8xf32> to vector<8x8xf32>
    %113 = vector.shape_cast %110 : vector<8x8xf32> to vector<1x1x1x8x8xf32>
    tpu.vector_store %arg19[%c0_54, %c0_55, %c3, %c0_56, %c0_57], %113 {strides = array<i32>} : memref<2x1x4x8x8xf32, #tpu.memory_space<vmem>>, vector<1x1x1x8x8xf32>,
    %cst_58 = arith.constant dense<0.000000e+00> : vector<8x8xf32>
    %114 = tpu.matmul %110, %96, %cst_58 {dimension_numbers = #tpu.dot_dimension_numbers<[1], [0], [0], [1], [0, 0, 1, 1], [], []>} : vector<8x8xf32>, vector<8x8xf32>, vector<8x8xf32> -> vector<8x8xf32>
    %115 = vector.extract_strided_slice %18 {offsets = [24, 0], sizes = [8, 32], strides = [1, 1]} : vector<32x32xf32> to vector<8x32xf32>
    %cst_59 = arith.constant dense<0.000000e+00> : vector<8x32xf32>
    %116 = tpu.matmul %114, %115, %cst_59 {dimension_numbers = #tpu.dot_dimension_numbers<[1], [0], [0], [1], [0, 0, 1, 1], [], []>} : vector<8x8xf32>, vector<8x32xf32>, vector<8x32xf32> -> vector<8x32xf32>
    %117 = arith.addf %93, %116 : vector<8x32xf32>
    %118 = arith.addf %117, %6 : vector<8x32xf32>
    %c0_60 = arith.constant 0 : index
    %c0_61 = arith.constant 0 : index
    %c0_62 = arith.constant 0 : index
    %119 = vector.load %arg8[%c0_60, %c0_61, %c0_62] : memref<2x1x32xf32, #tpu.memory_space<vmem>>, vector<1x1x32xf32>
    %120 = vector.shape_cast %119 : vector<1x1x32xf32> to vector<1x32xf32>
    %c0_63 = arith.constant 0 : index
    %c0_64 = arith.constant 0 : index
    %c0_65 = arith.constant 0 : index
    %121 = vector.load %arg9[%c0_63, %c0_64, %c0_65] : memref<2x1x32xf32, #tpu.memory_space<vmem>>, vector<1x1x32xf32>
    %122 = vector.shape_cast %121 : vector<1x1x32xf32> to vector<1x32xf32>
    %cst_66 = arith.constant dense<0.000000e+00> : vector<8xf32>
    %123 = vector.multi_reduction <add>, %118, %cst_66 [1] : vector<8x32xf32> to vector<8xf32>
    %124 = vector.shape_cast %123 : vector<8xf32> to vector<8x1xf32>
    %cst_67 = arith.constant 3.200000e+01 : f32
    %125 = vector.broadcast %cst_67 : f32 to vector<8x1xf32>
    %126 = arith.divf %124, %125 : vector<8x1xf32>
    %127 = vector.broadcast %126 : vector<8x1xf32> to vector<8x32xf32>
    %128 = arith.subf %118, %127 : vector<8x32xf32>
    %129 = arith.mulf %128, %128 : vector<8x32xf32>
    %cst_68 = arith.constant dense<0.000000e+00> : vector<8xf32>
    %130 = vector.multi_reduction <add>, %129, %cst_68 [1] : vector<8x32xf32> to vector<8xf32>
    %131 = vector.shape_cast %130 : vector<8xf32> to vector<8x1xf32>
    %cst_69 = arith.constant 3.200000e+01 : f32
    %132 = vector.broadcast %cst_69 : f32 to vector<8x1xf32>
    %133 = arith.divf %131, %132 : vector<8x1xf32>
    %134 = vector.broadcast %126 : vector<8x1xf32> to vector<8x32xf32>
    %135 = arith.subf %118, %134 : vector<8x32xf32>
    %cst_70 = arith.constant 9.99999974E-6 : f32
    %136 = vector.broadcast %cst_70 : f32 to vector<8x1xf32>
    %137 = arith.addf %133, %136 : vector<8x1xf32>
    %138 = math.rsqrt %137 : vector<8x1xf32>
    %139 = vector.broadcast %138 : vector<8x1xf32> to vector<8x32xf32>
    %140 = arith.mulf %135, %139 : vector<8x32xf32>
    %141 = vector.broadcast %120 : vector<1x32xf32> to vector<8x32xf32>
    %142 = arith.mulf %140, %141 : vector<8x32xf32>
    %143 = vector.broadcast %122 : vector<1x32xf32> to vector<8x32xf32>
    %144 = arith.addf %142, %143 : vector<8x32xf32>
    %c0_71 = arith.constant 0 : index
    %c0_72 = arith.constant 0 : index
    %c0_73 = arith.constant 0 : index
    %145 = vector.load %arg10[%c0_71, %c0_72, %c0_73] : memref<2x32x64xf32, #tpu.memory_space<vmem>>, vector<1x32x64xf32>
    %146 = vector.shape_cast %145 : vector<1x32x64xf32> to vector<32x64xf32>
    %cst_74 = arith.constant dense<0.000000e+00> : vector<8x64xf32>
    %147 = tpu.matmul %144, %146, %cst_74 {dimension_numbers = #tpu.dot_dimension_numbers<[1], [0], [0], [1], [0, 0, 1, 1], [], []>} : vector<8x32xf32>, vector<32x64xf32>, vector<8x64xf32> -> vector<8x64xf32>
    %c0_75 = arith.constant 0 : index
    %c0_76 = arith.constant 0 : index
    %c0_77 = arith.constant 0 : index
    %148 = vector.load %arg11[%c0_75, %c0_76, %c0_77] : memref<2x1x64xf32, #tpu.memory_space<vmem>>, vector<1x1x64xf32>
    %149 = vector.shape_cast %148 : vector<1x1x64xf32> to vector<1x64xf32>
    %150 = vector.broadcast %149 : vector<1x64xf32> to vector<8x64xf32>
    %151 = arith.addf %147, %150 : vector<8x64xf32>
    %cst_78 = arith.constant 0.000000e+00 : f32
    %152 = vector.broadcast %cst_78 : f32 to vector<8x64xf32>
    %153 = arith.maximumf %151, %152 : vector<8x64xf32>
    %c0_79 = arith.constant 0 : index
    %c0_80 = arith.constant 0 : index
    %c0_81 = arith.constant 0 : index
    %154 = vector.load %arg12[%c0_79, %c0_80, %c0_81] : memref<2x64x32xf32, #tpu.memory_space<vmem>>, vector<1x64x32xf32>
    %155 = vector.shape_cast %154 : vector<1x64x32xf32> to vector<64x32xf32>
    %cst_82 = arith.constant dense<0.000000e+00> : vector<8x32xf32>
    %156 = tpu.matmul %153, %155, %cst_82 {dimension_numbers = #tpu.dot_dimension_numbers<[1], [0], [0], [1], [0, 0, 1, 1], [], []>} : vector<8x64xf32>, vector<64x32xf32>, vector<8x32xf32> -> vector<8x32xf32>
    %c0_83 = arith.constant 0 : index
    %c0_84 = arith.constant 0 : index
    %c0_85 = arith.constant 0 : index
    %157 = vector.load %arg13[%c0_83, %c0_84, %c0_85] : memref<2x1x32xf32, #tpu.memory_space<vmem>>, vector<1x1x32xf32>
    %158 = vector.shape_cast %157 : vector<1x1x32xf32> to vector<1x32xf32>
    %159 = vector.broadcast %158 : vector<1x32xf32> to vector<8x32xf32>
    %160 = arith.addf %156, %159 : vector<8x32xf32>
    %161 = arith.addf %160, %144 : vector<8x32xf32>
    %c0_86 = arith.constant 0 : index
    %c0_87 = arith.constant 0 : index
    %c0_88 = arith.constant 0 : index
    %162 = vector.load %arg14[%c0_86, %c0_87, %c0_88] : memref<2x1x32xf32, #tpu.memory_space<vmem>>, vector<1x1x32xf32>
    %163 = vector.shape_cast %162 : vector<1x1x32xf32> to vector<1x32xf32>
    %c0_89 = arith.constant 0 : index
    %c0_90 = arith.constant 0 : index
    %c0_91 = arith.constant 0 : index
    %164 = vector.load %arg15[%c0_89, %c0_90, %c0_91] : memref<2x1x32xf32, #tpu.memory_space<vmem>>, vector<1x1x32xf32>
    %165 = vector.shape_cast %164 : vector<1x1x32xf32> to vector<1x32xf32>
    %cst_92 = arith.constant dense<0.000000e+00> : vector<8xf32>
    %166 = vector.multi_reduction <add>, %161, %cst_92 [1] : vector<8x32xf32> to vector<8xf32>
    %167 = vector.shape_cast %166 : vector<8xf32> to vector<8x1xf32>
    %cst_93 = arith.constant 3.200000e+01 : f32
    %168 = vector.broadcast %cst_93 : f32 to vector<8x1xf32>
    %169 = arith.divf %167, %168 : vector<8x1xf32>
    %170 = vector.broadcast %169 : vector<8x1xf32> to vector<8x32xf32>
    %171 = arith.subf %161, %170 : vector<8x32xf32>
    %172 = arith.mulf %171, %171 : vector<8x32xf32>
    %cst_94 = arith.constant dense<0.000000e+00> : vector<8xf32>
    %173 = vector.multi_reduction <add>, %172, %cst_94 [1] : vector<8x32xf32> to vector<8xf32>
    %174 = vector.shape_cast %173 : vector<8xf32> to vector<8x1xf32>
    %cst_95 = arith.constant 3.200000e+01 : f32
    %175 = vector.broadcast %cst_95 : f32 to vector<8x1xf32>
    %176 = arith.divf %174, %175 : vector<8x1xf32>
    %177 = vector.broadcast %169 : vector<8x1xf32> to vector<8x32xf32>
    %178 = arith.subf %161, %177 : vector<8x32xf32>
    %cst_96 = arith.constant 9.99999974E-6 : f32
    %179 = vector.broadcast %cst_96 : f32 to vector<8x1xf32>
    %180 = arith.addf %176, %179 : vector<8x1xf32>
    %181 = math.rsqrt %180 : vector<8x1xf32>
    %182 = vector.broadcast %181 : vector<8x1xf32> to vector<8x32xf32>
    %183 = arith.mulf %178, %182 : vector<8x32xf32>
    %184 = vector.broadcast %163 : vector<1x32xf32> to vector<8x32xf32>
    %185 = arith.mulf %183, %184 : vector<8x32xf32>
    %186 = vector.broadcast %165 : vector<1x32xf32> to vector<8x32xf32>
    %187 = arith.addf %185, %186 : vector<8x32xf32>
    %c1_97 = arith.constant 1 : index
    %c0_98 = arith.constant 0 : index
    %c0_99 = arith.constant 0 : index
    %188 = vector.load %arg4[%c1_97, %c0_98, %c0_99] : memref<2x32x96xf32, #tpu.memory_space<vmem>>, vector<1x32x96xf32>
    %189 = vector.shape_cast %188 : vector<1x32x96xf32> to vector<32x96xf32>
    %cst_100 = arith.constant dense<0.000000e+00> : vector<8x96xf32>
    %190 = tpu.matmul %187, %189, %cst_100 {dimension_numbers = #tpu.dot_dimension_numbers<[1], [0], [0], [1], [0, 0, 1, 1], [], []>} : vector<8x32xf32>, vector<32x96xf32>, vector<8x96xf32> -> vector<8x96xf32>
    %c1_101 = arith.constant 1 : index
    %c0_102 = arith.constant 0 : index
    %c0_103 = arith.constant 0 : index
    %191 = vector.load %arg5[%c1_101, %c0_102, %c0_103] : memref<2x1x96xf32, #tpu.memory_space<vmem>>, vector<1x1x96xf32>
    %192 = vector.shape_cast %191 : vector<1x1x96xf32> to vector<1x96xf32>
    %193 = vector.broadcast %192 : vector<1x96xf32> to vector<8x96xf32>
    %194 = arith.addf %190, %193 : vector<8x96xf32>
    %195 = vector.extract_strided_slice %194 {offsets = [0, 0], sizes = [8, 32], strides = [1, 1]} : vector<8x96xf32> to vector<8x32xf32>
    %196 = vector.extract_strided_slice %194 {offsets = [0, 32], sizes = [8, 32], strides = [1, 1]} : vector<8x96xf32> to vector<8x32xf32>
    %197 = vector.extract_strided_slice %194 {offsets = [0, 64], sizes = [8, 32], strides = [1, 1]} : vector<8x96xf32> to vector<8x32xf32>
    %c1_104 = arith.constant 1 : index
    %c0_105 = arith.constant 0 : index
    %c0_106 = arith.constant 0 : index
    %198 = vector.load %arg6[%c1_104, %c0_105, %c0_106] : memref<2x32x32xf32, #tpu.memory_space<vmem>>, vector<1x32x32xf32>
    %199 = vector.shape_cast %198 : vector<1x32x32xf32> to vector<32x32xf32>
    %c1_107 = arith.constant 1 : index
    %c0_108 = arith.constant 0 : index
    %c0_109 = arith.constant 0 : index
    %200 = vector.load %arg7[%c1_107, %c0_108, %c0_109] : memref<2x1x32xf32, #tpu.memory_space<vmem>>, vector<1x1x32xf32>
    %201 = vector.shape_cast %200 : vector<1x1x32xf32> to vector<1x32xf32>
    %202 = vector.extract_strided_slice %195 {offsets = [0, 0], sizes = [8, 8], strides = [1, 1]} : vector<8x32xf32> to vector<8x8xf32>
    %203 = vector.extract_strided_slice %196 {offsets = [0, 0], sizes = [8, 8], strides = [1, 1]} : vector<8x32xf32> to vector<8x8xf32>
    %204 = vector.extract_strided_slice %197 {offsets = [0, 0], sizes = [8, 8], strides = [1, 1]} : vector<8x32xf32> to vector<8x8xf32>
    %205 = tpu.transpose %203, [1, 0] : vector<8x8xf32> -> vector<8x8xf32>
    %cst_110 = arith.constant dense<0.000000e+00> : vector<8x8xf32>
    %206 = tpu.matmul %202, %205, %cst_110 {dimension_numbers = #tpu.dot_dimension_numbers<[1], [0], [0], [1], [0, 0, 1, 1], [], []>} : vector<8x8xf32>, vector<8x8xf32>, vector<8x8xf32> -> vector<8x8xf32>
    %cst_111 = arith.constant 0.353553385 : f32
    %207 = vector.broadcast %cst_111 : f32 to vector<8x8xf32>
    %208 = arith.mulf %206, %207 : vector<8x8xf32>
    %cst_112 = arith.constant dense<0xFF800000> : vector<8xf32>
    %209 = vector.multi_reduction <maximumf>, %208, %cst_112 [1] : vector<8x8xf32> to vector<8xf32>
    %210 = vector.shape_cast %209 : vector<8xf32> to vector<8x1xf32>
    %211 = vector.broadcast %210 : vector<8x1xf32> to vector<8x8xf32>
    %212 = arith.subf %208, %211 : vector<8x8xf32>
    %213 = math.exp %212 : vector<8x8xf32>
    %cst_113 = arith.constant dense<0.000000e+00> : vector<8xf32>
    %214 = vector.multi_reduction <add>, %213, %cst_113 [1] : vector<8x8xf32> to vector<8xf32>
    %215 = vector.shape_cast %214 : vector<8xf32> to vector<8x1xf32>
    %216 = tpu.reciprocal %215 {approx = true} : vector<8x1xf32> -> vector<8x1xf32>
    %217 = vector.broadcast %216 : vector<8x1xf32> to vector<8x8xf32>
    %218 = arith.mulf %213, %217 : vector<8x8xf32>
    %c1_114 = arith.constant 1 : index
    %c0_115 = arith.constant 0 : index
    %c0_116 = arith.constant 0 : index
    %c0_117 = arith.constant 0 : index
    %c0_118 = arith.constant 0 : index
    %219 = vector.load %arg19[%c1_114, %c0_115, %c0_116, %c0_117, %c0_118] : memref<2x1x4x8x8xf32, #tpu.memory_space<vmem>>, vector<1x1x1x8x8xf32>
    %220 = vector.shape_cast %219 : vector<1x1x1x8x8xf32> to vector<8x8xf32>
    %221 = vector.shape_cast %218 : vector<8x8xf32> to vector<1x1x1x8x8xf32>
    tpu.vector_store %arg19[%c1_114, %c0_115, %c0_116, %c0_117, %c0_118], %221 {strides = array<i32>} : memref<2x1x4x8x8xf32, #tpu.memory_space<vmem>>, vector<1x1x1x8x8xf32>,
    %cst_119 = arith.constant dense<0.000000e+00> : vector<8x8xf32>
    %222 = tpu.matmul %218, %204, %cst_119 {dimension_numbers = #tpu.dot_dimension_numbers<[1], [0], [0], [1], [0, 0, 1, 1], [], []>} : vector<8x8xf32>, vector<8x8xf32>, vector<8x8xf32> -> vector<8x8xf32>
    %223 = vector.extract_strided_slice %199 {offsets = [0, 0], sizes = [8, 32], strides = [1, 1]} : vector<32x32xf32> to vector<8x32xf32>
    %cst_120 = arith.constant dense<0.000000e+00> : vector<8x32xf32>
    %224 = tpu.matmul %222, %223, %cst_120 {dimension_numbers = #tpu.dot_dimension_numbers<[1], [0], [0], [1], [0, 0, 1, 1], [], []>} : vector<8x8xf32>, vector<8x32xf32>, vector<8x32xf32> -> vector<8x32xf32>
    %225 = vector.broadcast %201 : vector<1x32xf32> to vector<8x32xf32>
    %226 = arith.addf %225, %224 : vector<8x32xf32>
    %227 = vector.extract_strided_slice %195 {offsets = [0, 8], sizes = [8, 8], strides = [1, 1]} : vector<8x32xf32> to vector<8x8xf32>
    %228 = vector.extract_strided_slice %196 {offsets = [0, 8], sizes = [8, 8], strides = [1, 1]} : vector<8x32xf32> to vector<8x8xf32>
    %229 = vector.extract_strided_slice %197 {offsets = [0, 8], sizes = [8, 8], strides = [1, 1]} : vector<8x32xf32> to vector<8x8xf32>
    %230 = tpu.transpose %228, [1, 0] : vector<8x8xf32> -> vector<8x8xf32>
    %cst_121 = arith.constant dense<0.000000e+00> : vector<8x8xf32>
    %231 = tpu.matmul %227, %230, %cst_121 {dimension_numbers = #tpu.dot_dimension_numbers<[1], [0], [0], [1], [0, 0, 1, 1], [], []>} : vector<8x8xf32>, vector<8x8xf32>, vector<8x8xf32> -> vector<8x8xf32>
    %cst_122 = arith.constant 0.353553385 : f32
    %232 = vector.broadcast %cst_122 : f32 to vector<8x8xf32>
    %233 = arith.mulf %231, %232 : vector<8x8xf32>
    %cst_123 = arith.constant dense<0xFF800000> : vector<8xf32>
    %234 = vector.multi_reduction <maximumf>, %233, %cst_123 [1] : vector<8x8xf32> to vector<8xf32>
    %235 = vector.shape_cast %234 : vector<8xf32> to vector<8x1xf32>
    %236 = vector.broadcast %235 : vector<8x1xf32> to vector<8x8xf32>
    %237 = arith.subf %233, %236 : vector<8x8xf32>
    %238 = math.exp %237 : vector<8x8xf32>
    %cst_124 = arith.constant dense<0.000000e+00> : vector<8xf32>
    %239 = vector.multi_reduction <add>, %238, %cst_124 [1] : vector<8x8xf32> to vector<8xf32>
    %240 = vector.shape_cast %239 : vector<8xf32> to vector<8x1xf32>
    %241 = tpu.reciprocal %240 {approx = true} : vector<8x1xf32> -> vector<8x1xf32>
    %242 = vector.broadcast %241 : vector<8x1xf32> to vector<8x8xf32>
    %243 = arith.mulf %238, %242 : vector<8x8xf32>
    %c1_125 = arith.constant 1 : index
    %c0_126 = arith.constant 0 : index
    %c1_127 = arith.constant 1 : index
    %c0_128 = arith.constant 0 : index
    %c0_129 = arith.constant 0 : index
    %244 = vector.load %arg19[%c1_125, %c0_126, %c1_127, %c0_128, %c0_129] : memref<2x1x4x8x8xf32, #tpu.memory_space<vmem>>, vector<1x1x1x8x8xf32>
    %245 = vector.shape_cast %244 : vector<1x1x1x8x8xf32> to vector<8x8xf32>
    %246 = vector.shape_cast %243 : vector<8x8xf32> to vector<1x1x1x8x8xf32>
    tpu.vector_store %arg19[%c1_125, %c0_126, %c1_127, %c0_128, %c0_129], %246 {strides = array<i32>} : memref<2x1x4x8x8xf32, #tpu.memory_space<vmem>>, vector<1x1x1x8x8xf32>,
    %cst_130 = arith.constant dense<0.000000e+00> : vector<8x8xf32>
    %247 = tpu.matmul %243, %229, %cst_130 {dimension_numbers = #tpu.dot_dimension_numbers<[1], [0], [0], [1], [0, 0, 1, 1], [], []>} : vector<8x8xf32>, vector<8x8xf32>, vector<8x8xf32> -> vector<8x8xf32>
    %248 = vector.extract_strided_slice %199 {offsets = [8, 0], sizes = [8, 32], strides = [1, 1]} : vector<32x32xf32> to vector<8x32xf32>
    %cst_131 = arith.constant dense<0.000000e+00> : vector<8x32xf32>
    %249 = tpu.matmul %247, %248, %cst_131 {dimension_numbers = #tpu.dot_dimension_numbers<[1], [0], [0], [1], [0, 0, 1, 1], [], []>} : vector<8x8xf32>, vector<8x32xf32>, vector<8x32xf32> -> vector<8x32xf32>
    %250 = arith.addf %226, %249 : vector<8x32xf32>
    %251 = vector.extract_strided_slice %195 {offsets = [0, 16], sizes = [8, 8], strides = [1, 1]} : vector<8x32xf32> to vector<8x8xf32>
    %252 = vector.extract_strided_slice %196 {offsets = [0, 16], sizes = [8, 8], strides = [1, 1]} : vector<8x32xf32> to vector<8x8xf32>
    %253 = vector.extract_strided_slice %197 {offsets = [0, 16], sizes = [8, 8], strides = [1, 1]} : vector<8x32xf32> to vector<8x8xf32>
    %254 = tpu.transpose %252, [1, 0] : vector<8x8xf32> -> vector<8x8xf32>
    %cst_132 = arith.constant dense<0.000000e+00> : vector<8x8xf32>
    %255 = tpu.matmul %251, %254, %cst_132 {dimension_numbers = #tpu.dot_dimension_numbers<[1], [0], [0], [1], [0, 0, 1, 1], [], []>} : vector<8x8xf32>, vector<8x8xf32>, vector<8x8xf32> -> vector<8x8xf32>
    %cst_133 = arith.constant 0.353553385 : f32
    %256 = vector.broadcast %cst_133 : f32 to vector<8x8xf32>
    %257 = arith.mulf %255, %256 : vector<8x8xf32>
    %cst_134 = arith.constant dense<0xFF800000> : vector<8xf32>
    %258 = vector.multi_reduction <maximumf>, %257, %cst_134 [1] : vector<8x8xf32> to vector<8xf32>
    %259 = vector.shape_cast %258 : vector<8xf32> to vector<8x1xf32>
    %260 = vector.broadcast %259 : vector<8x1xf32> to vector<8x8xf32>
    %261 = arith.subf %257, %260 : vector<8x8xf32>
    %262 = math.exp %261 : vector<8x8xf32>
    %cst_135 = arith.constant dense<0.000000e+00> : vector<8xf32>
    %263 = vector.multi_reduction <add>, %262, %cst_135 [1] : vector<8x8xf32> to vector<8xf32>
    %264 = vector.shape_cast %263 : vector<8xf32> to vector<8x1xf32>
    %265 = tpu.reciprocal %264 {approx = true} : vector<8x1xf32> -> vector<8x1xf32>
    %266 = vector.broadcast %265 : vector<8x1xf32> to vector<8x8xf32>
    %267 = arith.mulf %262, %266 : vector<8x8xf32>
    %c1_136 = arith.constant 1 : index
    %c0_137 = arith.constant 0 : index
    %c2_138 = arith.constant 2 : index
    %c0_139 = arith.constant 0 : index
    %c0_140 = arith.constant 0 : index
    %268 = vector.load %arg19[%c1_136, %c0_137, %c2_138, %c0_139, %c0_140] : memref<2x1x4x8x8xf32, #tpu.memory_space<vmem>>, vector<1x1x1x8x8xf32>
    %269 = vector.shape_cast %268 : vector<1x1x1x8x8xf32> to vector<8x8xf32>
    %270 = vector.shape_cast %267 : vector<8x8xf32> to vector<1x1x1x8x8xf32>
    tpu.vector_store %arg19[%c1_136, %c0_137, %c2_138, %c0_139, %c0_140], %270 {strides = array<i32>} : memref<2x1x4x8x8xf32, #tpu.memory_space<vmem>>, vector<1x1x1x8x8xf32>,
    %cst_141 = arith.constant dense<0.000000e+00> : vector<8x8xf32>
    %271 = tpu.matmul %267, %253, %cst_141 {dimension_numbers = #tpu.dot_dimension_numbers<[1], [0], [0], [1], [0, 0, 1, 1], [], []>} : vector<8x8xf32>, vector<8x8xf32>, vector<8x8xf32> -> vector<8x8xf32>
    %272 = vector.extract_strided_slice %199 {offsets = [16, 0], sizes = [8, 32], strides = [1, 1]} : vector<32x32xf32> to vector<8x32xf32>
    %cst_142 = arith.constant dense<0.000000e+00> : vector<8x32xf32>
    %273 = tpu.matmul %271, %272, %cst_142 {dimension_numbers = #tpu.dot_dimension_numbers<[1], [0], [0], [1], [0, 0, 1, 1], [], []>} : vector<8x8xf32>, vector<8x32xf32>, vector<8x32xf32> -> vector<8x32xf32>
    %274 = arith.addf %250, %273 : vector<8x32xf32>
    %275 = vector.extract_strided_slice %195 {offsets = [0, 24], sizes = [8, 8], strides = [1, 1]} : vector<8x32xf32> to vector<8x8xf32>
    %276 = vector.extract_strided_slice %196 {offsets = [0, 24], sizes = [8, 8], strides = [1, 1]} : vector<8x32xf32> to vector<8x8xf32>
    %277 = vector.extract_strided_slice %197 {offsets = [0, 24], sizes = [8, 8], strides = [1, 1]} : vector<8x32xf32> to vector<8x8xf32>
    %278 = tpu.transpose %276, [1, 0] : vector<8x8xf32> -> vector<8x8xf32>
    %cst_143 = arith.constant dense<0.000000e+00> : vector<8x8xf32>
    %279 = tpu.matmul %275, %278, %cst_143 {dimension_numbers = #tpu.dot_dimension_numbers<[1], [0], [0], [1], [0, 0, 1, 1], [], []>} : vector<8x8xf32>, vector<8x8xf32>, vector<8x8xf32> -> vector<8x8xf32>
    %cst_144 = arith.constant 0.353553385 : f32
    %280 = vector.broadcast %cst_144 : f32 to vector<8x8xf32>
    %281 = arith.mulf %279, %280 : vector<8x8xf32>
    %cst_145 = arith.constant dense<0xFF800000> : vector<8xf32>
    %282 = vector.multi_reduction <maximumf>, %281, %cst_145 [1] : vector<8x8xf32> to vector<8xf32>
    %283 = vector.shape_cast %282 : vector<8xf32> to vector<8x1xf32>
    %284 = vector.broadcast %283 : vector<8x1xf32> to vector<8x8xf32>
    %285 = arith.subf %281, %284 : vector<8x8xf32>
    %286 = math.exp %285 : vector<8x8xf32>
    %cst_146 = arith.constant dense<0.000000e+00> : vector<8xf32>
    %287 = vector.multi_reduction <add>, %286, %cst_146 [1] : vector<8x8xf32> to vector<8xf32>
    %288 = vector.shape_cast %287 : vector<8xf32> to vector<8x1xf32>
    %289 = tpu.reciprocal %288 {approx = true} : vector<8x1xf32> -> vector<8x1xf32>
    %290 = vector.broadcast %289 : vector<8x1xf32> to vector<8x8xf32>
    %291 = arith.mulf %286, %290 : vector<8x8xf32>
    %c1_147 = arith.constant 1 : index
    %c0_148 = arith.constant 0 : index
    %c3_149 = arith.constant 3 : index
    %c0_150 = arith.constant 0 : index
    %c0_151 = arith.constant 0 : index
    %292 = vector.load %arg19[%c1_147, %c0_148, %c3_149, %c0_150, %c0_151] : memref<2x1x4x8x8xf32, #tpu.memory_space<vmem>>, vector<1x1x1x8x8xf32>
    %293 = vector.shape_cast %292 : vector<1x1x1x8x8xf32> to vector<8x8xf32>
    %294 = vector.shape_cast %291 : vector<8x8xf32> to vector<1x1x1x8x8xf32>
    tpu.vector_store %arg19[%c1_147, %c0_148, %c3_149, %c0_150, %c0_151], %294 {strides = array<i32>} : memref<2x1x4x8x8xf32, #tpu.memory_space<vmem>>, vector<1x1x1x8x8xf32>,
    %cst_152 = arith.constant dense<0.000000e+00> : vector<8x8xf32>
    %295 = tpu.matmul %291, %277, %cst_152 {dimension_numbers = #tpu.dot_dimension_numbers<[1], [0], [0], [1], [0, 0, 1, 1], [], []>} : vector<8x8xf32>, vector<8x8xf32>, vector<8x8xf32> -> vector<8x8xf32>
    %296 = vector.extract_strided_slice %199 {offsets = [24, 0], sizes = [8, 32], strides = [1, 1]} : vector<32x32xf32> to vector<8x32xf32>
    %cst_153 = arith.constant dense<0.000000e+00> : vector<8x32xf32>
    %297 = tpu.matmul %295, %296, %cst_153 {dimension_numbers = #tpu.dot_dimension_numbers<[1], [0], [0], [1], [0, 0, 1, 1], [], []>} : vector<8x8xf32>, vector<8x32xf32>, vector<8x32xf32> -> vector<8x32xf32>
    %298 = arith.addf %274, %297 : vector<8x32xf32>
    %299 = arith.addf %298, %187 : vector<8x32xf32>
    %c1_154 = arith.constant 1 : index
    %c0_155 = arith.constant 0 : index
    %c0_156 = arith.constant 0 : index
    %300 = vector.load %arg8[%c1_154, %c0_155, %c0_156] : memref<2x1x32xf32, #tpu.memory_space<vmem>>, vector<1x1x32xf32>
    %301 = vector.shape_cast %300 : vector<1x1x32xf32> to vector<1x32xf32>
    %c1_157 = arith.constant 1 : index
    %c0_158 = arith.constant 0 : index
    %c0_159 = arith.constant 0 : index
    %302 = vector.load %arg9[%c1_157, %c0_158, %c0_159] : memref<2x1x32xf32, #tpu.memory_space<vmem>>, vector<1x1x32xf32>
    %303 = vector.shape_cast %302 : vector<1x1x32xf32> to vector<1x32xf32>
    %cst_160 = arith.constant dense<0.000000e+00> : vector<8xf32>
    %304 = vector.multi_reduction <add>, %299, %cst_160 [1] : vector<8x32xf32> to vector<8xf32>
    %305 = vector.shape_cast %304 : vector<8xf32> to vector<8x1xf32>
    %cst_161 = arith.constant 3.200000e+01 : f32
    %306 = vector.broadcast %cst_161 : f32 to vector<8x1xf32>
    %307 = arith.divf %305, %306 : vector<8x1xf32>
    %308 = vector.broadcast %307 : vector<8x1xf32> to vector<8x32xf32>
    %309 = arith.subf %299, %308 : vector<8x32xf32>
    %310 = arith.mulf %309, %309 : vector<8x32xf32>
    %cst_162 = arith.constant dense<0.000000e+00> : vector<8xf32>
    %311 = vector.multi_reduction <add>, %310, %cst_162 [1] : vector<8x32xf32> to vector<8xf32>
    %312 = vector.shape_cast %311 : vector<8xf32> to vector<8x1xf32>
    %cst_163 = arith.constant 3.200000e+01 : f32
    %313 = vector.broadcast %cst_163 : f32 to vector<8x1xf32>
    %314 = arith.divf %312, %313 : vector<8x1xf32>
    %315 = vector.broadcast %307 : vector<8x1xf32> to vector<8x32xf32>
    %316 = arith.subf %299, %315 : vector<8x32xf32>
    %cst_164 = arith.constant 9.99999974E-6 : f32
    %317 = vector.broadcast %cst_164 : f32 to vector<8x1xf32>
    %318 = arith.addf %314, %317 : vector<8x1xf32>
    %319 = math.rsqrt %318 : vector<8x1xf32>
    %320 = vector.broadcast %319 : vector<8x1xf32> to vector<8x32xf32>
    %321 = arith.mulf %316, %320 : vector<8x32xf32>
    %322 = vector.broadcast %301 : vector<1x32xf32> to vector<8x32xf32>
    %323 = arith.mulf %321, %322 : vector<8x32xf32>
    %324 = vector.broadcast %303 : vector<1x32xf32> to vector<8x32xf32>
    %325 = arith.addf %323, %324 : vector<8x32xf32>
    %c1_165 = arith.constant 1 : index
    %c0_166 = arith.constant 0 : index
    %c0_167 = arith.constant 0 : index
    %326 = vector.load %arg10[%c1_165, %c0_166, %c0_167] : memref<2x32x64xf32, #tpu.memory_space<vmem>>, vector<1x32x64xf32>
    %327 = vector.shape_cast %326 : vector<1x32x64xf32> to vector<32x64xf32>
    %cst_168 = arith.constant dense<0.000000e+00> : vector<8x64xf32>
    %328 = tpu.matmul %325, %327, %cst_168 {dimension_numbers = #tpu.dot_dimension_numbers<[1], [0], [0], [1], [0, 0, 1, 1], [], []>} : vector<8x32xf32>, vector<32x64xf32>, vector<8x64xf32> -> vector<8x64xf32>
    %c1_169 = arith.constant 1 : index
    %c0_170 = arith.constant 0 : index
    %c0_171 = arith.constant 0 : index
    %329 = vector.load %arg11[%c1_169, %c0_170, %c0_171] : memref<2x1x64xf32, #tpu.memory_space<vmem>>, vector<1x1x64xf32>
    %330 = vector.shape_cast %329 : vector<1x1x64xf32> to vector<1x64xf32>
    %331 = vector.broadcast %330 : vector<1x64xf32> to vector<8x64xf32>
    %332 = arith.addf %328, %331 : vector<8x64xf32>
    %cst_172 = arith.constant 0.000000e+00 : f32
    %333 = vector.broadcast %cst_172 : f32 to vector<8x64xf32>
    %334 = arith.maximumf %332, %333 : vector<8x64xf32>
    %c1_173 = arith.constant 1 : index
    %c0_174 = arith.constant 0 : index
    %c0_175 = arith.constant 0 : index
    %335 = vector.load %arg12[%c1_173, %c0_174, %c0_175] : memref<2x64x32xf32, #tpu.memory_space<vmem>>, vector<1x64x32xf32>
    %336 = vector.shape_cast %335 : vector<1x64x32xf32> to vector<64x32xf32>
    %cst_176 = arith.constant dense<0.000000e+00> : vector<8x32xf32>
    %337 = tpu.matmul %334, %336, %cst_176 {dimension_numbers = #tpu.dot_dimension_numbers<[1], [0], [0], [1], [0, 0, 1, 1], [], []>} : vector<8x64xf32>, vector<64x32xf32>, vector<8x32xf32> -> vector<8x32xf32>
    %c1_177 = arith.constant 1 : index
    %c0_178 = arith.constant 0 : index
    %c0_179 = arith.constant 0 : index
    %338 = vector.load %arg13[%c1_177, %c0_178, %c0_179] : memref<2x1x32xf32, #tpu.memory_space<vmem>>, vector<1x1x32xf32>
    %339 = vector.shape_cast %338 : vector<1x1x32xf32> to vector<1x32xf32>
    %340 = vector.broadcast %339 : vector<1x32xf32> to vector<8x32xf32>
    %341 = arith.addf %337, %340 : vector<8x32xf32>
    %342 = arith.addf %341, %325 : vector<8x32xf32>
    %c1_180 = arith.constant 1 : index
    %c0_181 = arith.constant 0 : index
    %c0_182 = arith.constant 0 : index
    %343 = vector.load %arg14[%c1_180, %c0_181, %c0_182] : memref<2x1x32xf32, #tpu.memory_space<vmem>>, vector<1x1x32xf32>
    %344 = vector.shape_cast %343 : vector<1x1x32xf32> to vector<1x32xf32>
    %c1_183 = arith.constant 1 : index
    %c0_184 = arith.constant 0 : index
    %c0_185 = arith.constant 0 : index
    %345 = vector.load %arg15[%c1_183, %c0_184, %c0_185] : memref<2x1x32xf32, #tpu.memory_space<vmem>>, vector<1x1x32xf32>
    %346 = vector.shape_cast %345 : vector<1x1x32xf32> to vector<1x32xf32>
    %cst_186 = arith.constant dense<0.000000e+00> : vector<8xf32>
    %347 = vector.multi_reduction <add>, %342, %cst_186 [1] : vector<8x32xf32> to vector<8xf32>
    %348 = vector.shape_cast %347 : vector<8xf32> to vector<8x1xf32>
    %cst_187 = arith.constant 3.200000e+01 : f32
    %349 = vector.broadcast %cst_187 : f32 to vector<8x1xf32>
    %350 = arith.divf %348, %349 : vector<8x1xf32>
    %351 = vector.broadcast %350 : vector<8x1xf32> to vector<8x32xf32>
    %352 = arith.subf %342, %351 : vector<8x32xf32>
    %353 = arith.mulf %352, %352 : vector<8x32xf32>
    %cst_188 = arith.constant dense<0.000000e+00> : vector<8xf32>
    %354 = vector.multi_reduction <add>, %353, %cst_188 [1] : vector<8x32xf32> to vector<8xf32>
    %355 = vector.shape_cast %354 : vector<8xf32> to vector<8x1xf32>
    %cst_189 = arith.constant 3.200000e+01 : f32
    %356 = vector.broadcast %cst_189 : f32 to vector<8x1xf32>
    %357 = arith.divf %355, %356 : vector<8x1xf32>
    %358 = vector.broadcast %350 : vector<8x1xf32> to vector<8x32xf32>
    %359 = arith.subf %342, %358 : vector<8x32xf32>
    %cst_190 = arith.constant 9.99999974E-6 : f32
    %360 = vector.broadcast %cst_190 : f32 to vector<8x1xf32>
    %361 = arith.addf %357, %360 : vector<8x1xf32>
    %362 = math.rsqrt %361 : vector<8x1xf32>
    %363 = vector.broadcast %362 : vector<8x1xf32> to vector<8x32xf32>
    %364 = arith.mulf %359, %363 : vector<8x32xf32>
    %365 = vector.broadcast %344 : vector<1x32xf32> to vector<8x32xf32>
    %366 = arith.mulf %364, %365 : vector<8x32xf32>
    %367 = vector.broadcast %346 : vector<1x32xf32> to vector<8x32xf32>
    %368 = arith.addf %366, %367 : vector<8x32xf32>
    %cst_191 = arith.constant dense<0.000000e+00> : vector<32xf32>
    %369 = vector.multi_reduction <add>, %368, %cst_191 [0] : vector<8x32xf32> to vector<32xf32>
    %370 = vector.shape_cast %369 : vector<32xf32> to vector<1x32xf32>
    %cst_192 = arith.constant 8.000000e+00 : f32
    %371 = vector.broadcast %cst_192 : f32 to vector<1x32xf32>
    %372 = arith.divf %370, %371 : vector<1x32xf32>
    %c0_193 = arith.constant 0 : index
    %c0_194 = arith.constant 0 : index
    %373 = vector.load %arg16[%c0_193, %c0_194] : memref<32x5xf32, #tpu.memory_space<vmem>>, vector<32x5xf32>
    %cst_195 = arith.constant dense<0.000000e+00> : vector<1x5xf32>
    %374 = tpu.matmul %372, %373, %cst_195 {dimension_numbers = #tpu.dot_dimension_numbers<[1], [0], [0], [1], [0, 0, 1, 1], [], []>} : vector<1x32xf32>, vector<32x5xf32>, vector<1x5xf32> -> vector<1x5xf32>
    %c0_196 = arith.constant 0 : index
    %c0_197 = arith.constant 0 : index
    %375 = vector.load %arg17[%c0_196, %c0_197] : memref<1x5xf32, #tpu.memory_space<vmem>>, vector<1x5xf32>
    %376 = arith.addf %374, %375 : vector<1x5xf32>
    %cst_198 = arith.constant dense<0xFF800000> : vector<1xf32>
    %377 = vector.multi_reduction <maximumf>, %376, %cst_198 [1] : vector<1x5xf32> to vector<1xf32>
    %378 = vector.shape_cast %377 : vector<1xf32> to vector<1x1xf32>
    %379 = vector.broadcast %378 : vector<1x1xf32> to vector<1x5xf32>
    %380 = arith.subf %376, %379 : vector<1x5xf32>
    %381 = math.exp %380 : vector<1x5xf32>
    %cst_199 = arith.constant dense<0.000000e+00> : vector<1xf32>
    %382 = vector.multi_reduction <add>, %381, %cst_199 [1] : vector<1x5xf32> to vector<1xf32>
    %383 = vector.shape_cast %382 : vector<1xf32> to vector<1x1xf32>
    %384 = math.log %383 : vector<1x1xf32>
    %385 = vector.broadcast %384 : vector<1x1xf32> to vector<1x5xf32>
    %386 = arith.subf %380, %385 : vector<1x5xf32>
    %c0_200 = arith.constant 0 : index
    %c0_201 = arith.constant 0 : index
    %c0_202 = arith.constant 0 : index
    %387 = vector.load %arg18[%c0_200, %c0_201, %c0_202] : memref<1x1x5xf32, #tpu.memory_space<vmem>>, vector<1x1x5xf32>
    %388 = vector.shape_cast %387 : vector<1x1x5xf32> to vector<1x5xf32>
    %389 = vector.shape_cast %386 : vector<1x5xf32> to vector<1x1x5xf32>
    tpu.vector_store %arg18[%c0_200, %c0_201, %c0_202], %389 {strides = array<i32>} : memref<1x1x5xf32, #tpu.memory_space<vmem>>, vector<1x1x5xf32>,
    return
  }
  func.func @transform_0(%arg0: i32) -> (i32, i32, i32) {
    %c0_i32 = arith.constant 0 : i32
    %c0_i32_0 = arith.constant 0 : i32
    %c0_i32_1 = arith.constant 0 : i32
    return %arg0, %c0_i32, %c0_i32_0 : i32, i32, i32
  }
  func.func @transform_1(%arg0: i32) -> (i32, i32) {
    %c0_i32 = arith.constant 0 : i32
    %c0_i32_0 = arith.constant 0 : i32
    %c0_i32_1 = arith.constant 0 : i32
    return %c0_i32, %c0_i32_0 : i32, i32
  }
  func.func @transform_2(%arg0: i32) -> (i32, i32) {
    %c0_i32 = arith.constant 0 : i32
    %c0_i32_0 = arith.constant 0 : i32
    %c0_i32_1 = arith.constant 0 : i32
    return %c0_i32, %c0_i32_0 : i32, i32
  }
  func.func @transform_3(%arg0: i32) -> (i32, i32, i32) {
    %c0_i32 = arith.constant 0 : i32
    %c0_i32_0 = arith.constant 0 : i32
    %c0_i32_1 = arith.constant 0 : i32
    %c0_i32_2 = arith.constant 0 : i32
    return %c0_i32, %c0_i32_0, %c0_i32_1 : i32, i32, i32
  }
  func.func @transform_4(%arg0: i32) -> (i32, i32, i32) {
    %c0_i32 = arith.constant 0 : i32
    %c0_i32_0 = arith.constant 0 : i32
    %c0_i32_1 = arith.constant 0 : i32
    %c0_i32_2 = arith.constant 0 : i32
    return %c0_i32, %c0_i32_0, %c0_i32_1 : i32, i32, i32
  }
  func.func @transform_5(%arg0: i32) -> (i32, i32, i32) {
    %c0_i32 = arith.constant 0 : i32
    %c0_i32_0 = arith.constant 0 : i32
    %c0_i32_1 = arith.constant 0 : i32
    %c0_i32_2 = arith.constant 0 : i32
    return %c0_i32, %c0_i32_0, %c0_i32_1 : i32, i32, i32
  }
  func.func @transform_6(%arg0: i32) -> (i32, i32, i32) {
    %c0_i32 = arith.constant 0 : i32
    %c0_i32_0 = arith.constant 0 : i32
    %c0_i32_1 = arith.constant 0 : i32
    %c0_i32_2 = arith.constant 0 : i32
    return %c0_i32, %c0_i32_0, %c0_i32_1 : i32, i32, i32
  }
  func.func @transform_7(%arg0: i32) -> (i32, i32, i32) {
    %c0_i32 = arith.constant 0 : i32
    %c0_i32_0 = arith.constant 0 : i32
    %c0_i32_1 = arith.constant 0 : i32
    %c0_i32_2 = arith.constant 0 : i32
    return %c0_i32, %c0_i32_0, %c0_i32_1 : i32, i32, i32
  }
  func.func @transform_8(%arg0: i32) -> (i32, i32, i32) {
    %c0_i32 = arith.constant 0 : i32
    %c0_i32_0 = arith.constant 0 : i32
    %c0_i32_1 = arith.constant 0 : i32
    %c0_i32_2 = arith.constant 0 : i32
    return %c0_i32, %c0_i32_0, %c0_i32_1 : i32, i32, i32
  }
  func.func @transform_9(%arg0: i32) -> (i32, i32, i32) {
    %c0_i32 = arith.constant 0 : i32
    %c0_i32_0 = arith.constant 0 : i32
    %c0_i32_1 = arith.constant 0 : i32
    %c0_i32_2 = arith.constant 0 : i32
    return %c0_i32, %c0_i32_0, %c0_i32_1 : i32, i32, i32
  }
  func.func @transform_10(%arg0: i32) -> (i32, i32, i32) {
    %c0_i32 = arith.constant 0 : i32
    %c0_i32_0 = arith.constant 0 : i32
    %c0_i32_1 = arith.constant 0 : i32
    %c0_i32_2 = arith.constant 0 : i32
    return %c0_i32, %c0_i32_0, %c0_i32_1 : i32, i32, i32
  }
  func.func @transform_11(%arg0: i32) -> (i32, i32, i32) {
    %c0_i32 = arith.constant 0 : i32
    %c0_i32_0 = arith.constant 0 : i32
    %c0_i32_1 = arith.constant 0 : i32
    %c0_i32_2 = arith.constant 0 : i32
    return %c0_i32, %c0_i32_0, %c0_i32_1 : i32, i32, i32
  }
  func.func @transform_12(%arg0: i32) -> (i32, i32, i32) {
    %c0_i32 = arith.constant 0 : i32
    %c0_i32_0 = arith.constant 0 : i32
    %c0_i32_1 = arith.constant 0 : i32
    %c0_i32_2 = arith.constant 0 : i32
    return %c0_i32, %c0_i32_0, %c0_i32_1 : i32, i32, i32
  }
  func.func @transform_13(%arg0: i32) -> (i32, i32, i32) {
    %c0_i32 = arith.constant 0 : i32
    %c0_i32_0 = arith.constant 0 : i32
    %c0_i32_1 = arith.constant 0 : i32
    %c0_i32_2 = arith.constant 0 : i32
    return %c0_i32, %c0_i32_0, %c0_i32_1 : i32, i32, i32
  }
  func.func @transform_14(%arg0: i32) -> (i32, i32, i32) {
    %c0_i32 = arith.constant 0 : i32
    %c0_i32_0 = arith.constant 0 : i32
    %c0_i32_1 = arith.constant 0 : i32
    %c0_i32_2 = arith.constant 0 : i32
    return %c0_i32, %c0_i32_0, %c0_i32_1 : i32, i32, i32
  }
  func.func @transform_15(%arg0: i32) -> (i32, i32) {
    %c0_i32 = arith.constant 0 : i32
    %c0_i32_0 = arith.constant 0 : i32
    %c0_i32_1 = arith.constant 0 : i32
    return %c0_i32, %c0_i32_0 : i32, i32
  }
  func.func @transform_16(%arg0: i32) -> (i32, i32) {
    %c0_i32 = arith.constant 0 : i32
    %c0_i32_0 = arith.constant 0 : i32
    %c0_i32_1 = arith.constant 0 : i32
    return %c0_i32, %c0_i32_0 : i32, i32
  }
  func.func @transform_17(%arg0: i32) -> (i32, i32, i32) {
    %c0_i32 = arith.constant 0 : i32
    %c0_i32_0 = arith.constant 0 : i32
    %c0_i32_1 = arith.constant 0 : i32
    return %arg0, %c0_i32, %c0_i32_0 : i32, i32, i32
  }
  func.func @transform_18(%arg0: i32) -> (i32, i32, i32, i32, i32) {
    %c0_i32 = arith.constant 0 : i32
    %c0_i32_0 = arith.constant 0 : i32
    %c0_i32_1 = arith.constant 0 : i32
    %c0_i32_2 = arith.constant 0 : i32
    %c0_i32_3 = arith.constant 0 : i32
    return %c0_i32, %arg0, %c0_i32_0, %c0_i32_1, %c0_i32_2 : i32, i32, i32, i32, i32
  }
}

</mosaic_0001>

<bundles_post_ra>
// kernel: tpu_custom_call.1
= control target key start
LH: loop header
LB: loop body
LE: loop exit
PB: predicated region body
PF: predicated region fallthrough
CT: control target
= control target key end

     0   :  { %s3253_s0 = inlined_call_operand.vmem [shape: f32[2,8,6], index: 0, kind: input, shape index: {}]   ;;  %s3254_s1 = inlined_call_operand.hbm [shape: f32[6,32], index: 1, kind: input, shape index: {}]   ;;  %s3255_s2 = inlined_call_operand.vmem [shape: f32[1,32], index: 2, kind: input, shape index: {}]   ;;  %s3256_s3 = inlined_call_operand.vmem [shape: f32[2,32,96], index: 3, kind: input, shape index: {}]   ;;  %s3257_s4 = inlined_call_operand.vmem [shape: f32[2,1,96], index: 4, kind: input, shape index: {}]   ;;  %s3258_s5 = inlined_call_operand.vmem [shape: f32[2,32,32], index: 5, kind: input, shape index: {}]   ;;  %s3259_s6 = inlined_call_operand.vmem [shape: f32[2,1,32], index: 6, kind: input, shape index: {}]   ;;  %s3260_s7 = inlined_call_operand.vmem [shape: f32[2,1,32], index: 7, kind: input, shape index: {}]   ;;  %s3261_s8 = inlined_call_operand.hbm [shape: f32[2,1,32], index: 8, kind: input, shape index: {}]   ;;  %s3262_s9 = inlined_call_operand.vmem [shape: f32[2,32,64], index: 9, kind: input, shape index: {}]   ;;  %s3263_s10 = inlined_call_operand.hbm [shape: f32[2,1,64], index: 10, kind: input, shape index: {}]   ;;  %s3264_s11 = inlined_call_operand.vmem [shape: f32[2,64,32], index: 11, kind: input, shape index: {}]   ;;  %s3265_s12 = inlined_call_operand.hbm [shape: f32[2,1,32], index: 12, kind: input, shape index: {}]   ;;  %s3266_s13 = inlined_call_operand.hbm [shape: f32[2,1,32], index: 13, kind: input, shape index: {}]   ;;  %s3267_s14 = inlined_call_operand.hbm [shape: f32[2,1,32], index: 14, kind: input, shape index: {}]   ;;  %s3268_s15 = inlined_call_operand.vmem [shape: f32[32,5], index: 15, kind: input, shape index: {}]   ;;  %s3269_s16 = inlined_call_operand.vmem [shape: f32[1,5], index: 16, kind: input, shape index: {}]   ;;  %s3270_s17 = inlined_call_operand.hbm [shape: f32[2,1,5], index: 17, kind: output, shape index: {0}]   ;;  %s3271_s18 = inlined_call_operand.hbm [shape: f32[2,2,4,8,8], index: 18, kind: output, shape index: {1}]  }
   0x1   :  { %3287 = sst [smem:[#allocation31_spill]] %s3253_s0 }
   0x2   :  { %3288 = sst [smem:[#allocation32_spill]] %s3254_s1 }
   0x3   :  { %3289 = sst [smem:[#allocation33_spill]] %s3255_s2 }
   0x4   :  { %3290 = sst [smem:[#allocation34_spill]] %s3261_s8 }
   0x5   :  { %3291 = sst [smem:[#allocation35_spill]] %s3265_s12 }
   0x6   :  { %3292 = sst [smem:[#allocation36_spill]] %s3270_s17 }
   0x7   :  { %3293 = sst [smem:[#allocation37_spill]] %s3271_s18 }
   0x8   :  { %24 = vsyncpa [#allocation3], 0 }
   0x9   :  { %25 = vsyncpa [#allocation6], 0 }
   0xa   :  { %26 = vsyncpa [#allocation9], 0 }
   0xb   :  { %27 = vsyncpa [#allocation12], 0 }
   0xc   :  { %28 = vsyncpa [#allocation4], 0 }
   0xd   :  { %30 = vsyncpa [#allocation4 + $0x1], 0 }
   0xe   :  { %31 = vsyncpa [#allocation15], 0 }
   0xf   :  { %33 = vsyncpa [#allocation15 + $0x1], 0  ;;  %s2755_s27 = smov 0   ;;  %s2757_s28 = smov 0  }
  0x10   :  { %s2759_s29 = smov 0   ;;  %s2761_s30 = smov 0  }
  0x11 LB: > { %3294 = sst [smem:[#allocation24_spill]] %s2618_s27  ;;  %s2776_s0 = sadd.s32 4294967295, %s2630_s30   ;;  %s2630_s30 = sphi %s2761_s30, %s3322_s30   ;;  %s2626_s29 = sphi %s2759_s29, %s3327_s29   ;;  %s2622_s28 = sphi %s2757_s28, %s3326_s28   ;;  %s2618_s27 = sphi %s2755_s27, %s3325_s27  }
  0x12   : > { %3295 = sst [smem:[#allocation25_spill]] %s2626_s29  ;;  %s2075_s19 = sadd.s32 4294967294, %s2630_s30  }
  0x13   : > { %3296 = sst [smem:[#allocation26_spill]] %s2630_s30  ;;  %s2780_s1 = sadd.s32 1, %s2630_s30  }
  0x14   : > { %3297 = sst [smem:[#allocation27_spill]] %s2780_s1  ;;  %s408_s20 = sadd.s32 1, %s2626_s29 }
  0x15   : > { %s405_s21 = ssub.s32 %s2630_s30, %s2780_s1  ;;  %p418_p0 = scmp.ne.s32.totalorder %s2626_s29, %s2622_s28 }
  0x16   : > { %p406_p1 = scmp.eq.s32.totalorder %s405_s21, 0  ;;  %p419_p2 = scmp.eq.s32.totalorder %s2776_s0, 1 }
  0x17   : > { %p424_p3 = scmp.ne.s32.totalorder %s2622_s28, %s2618_s27  ;;  %p425_p4 = scmp.eq.s32.totalorder %s2075_s19, 1 }
  0x18   : > { %s2791_s22 = scalar_select %p406_p1, %s2626_s29, %s408_s20  }
  0x19   : > { %p2793_p5 = por %p419_p2, %p418_p0  ;;  %p2797_p6 = por %p425_p4, %p424_p3 }
  0x1a   : > { %3298 = sst [smem:[#allocation28_spill]] %s2791_s22  ;;  %p2076_p7 = scmp.ge.s32.totalorder %s2630_s30, 1 }
  0x1b   : > { %s3299_s2 = scalar_select %p2793_p5, 1, 0 }
  0x1c   : > { %s3301_s23 = scalar_select %p2797_p6, 1, 0 }
  0x1d   : > { %3300 = sst [smem:[#allocation29_spill]] %s3299_s2  ;;  %p458_p8 = scmp.lt.s32.totalorder %s2630_s30, 3 }
  0x1e   : > { %3302 = sst [smem:[#allocation30_spill]] %s3301_s23  ;;  %p2230_p9 = scmp.eq.s32.totalorder %s2776_s0, 0 }
  0x1f   : > { %p2804_p10 = pnand %p2076_p7, %p458_p8  ;;  %s3304_s8 = sld [smem:[#allocation34_spill]] }
  0x20   : > { %s2632_s20 = smov [#allocation5]   ;;  %s3306_s12 = sld [smem:[#allocation35_spill]] }
  0x21   : > { %p2204_p11 = pneg %p2804_p10  ;;  %s501_s21 = sshll.u32 %s2632_s20, 4  ;;  %s502_s21 = int_to_ptr.vmem [resolvable:$true] %s501_s21 }
  0x22   : > { %s2633_s25 = smov 16   ;;  %s2634_s26 = smov 1  }
  0x23   : > { %p2815_p12 = pnand %p2230_p9, %p2204_p11  ;;  %s2635_s20 = smov [#allocation8]  }
  0x24   : > { %s3307_s18 = sld [smem:[#allocation32_spill]]  ;;  %s2636_s17 = smov [#allocation2]  }
  0x25   : > { %s499_s19 = sshll.u32 %s3304_s8, 4  ;;  %s535_s8 = sshll.u32 %s2635_s20, 4  ;;  %s500_s19 = int_to_ptr.hbm [resolvable:$true] %s499_s19  ;;  %s536_s8 = int_to_ptr.vmem [resolvable:$true] %s535_s8 }
  0x26   : > { %s533_s23 = sshll.u32 %s3306_s12, 4  ;;  %s516_s12 = sshll.u32 %s3263_s10, 4  ;;  %s534_s23 = int_to_ptr.hbm [resolvable:$true] %s533_s23  ;;  %s517_s12 = int_to_ptr.hbm [resolvable:$true] %s516_s12 }
  0x27   : > { %2210 = dma.hbm_to_vmem [thread:$0]  (!%p2815_p12), %s500_s19, 32, %s502_s21, [#allocation6], %s2633_s25, %s2633_s25, %s2634_s26  }
  0x28   : > { %2216 = dma.hbm_to_vmem [thread:$0]  (!%p2815_p12), %s534_s23, 32, %s536_s8, [#allocation9], %s2633_s25, %s2633_s25, %s2634_s26  }
  0x29   : > { %s472_s19 = sshll.u32 %s2636_s17, 4  ;;  %s547_s20 = sshll.u32 %s3266_s13, 4  ;;  %s473_s19 = int_to_ptr.vmem [resolvable:$true] %s472_s19  ;;  %s548_s20 = int_to_ptr.hbm [resolvable:$true] %s547_s20 }
  0x2a   : > { %s470_s2 = sshll.u32 %s3307_s18, 4  ;;  %s2637_s18 = smov [#allocation7]   ;;  %s471_s2 = int_to_ptr.hbm [resolvable:$true] %s470_s2 }
  0x2b   : > { %2207 = dma.hbm_to_vmem [thread:$0]  (!%p2815_p12), %s471_s2, 128, %s473_s19, [#allocation3]  }
  0x2c   : > { %s518_s27 = sshll.u32 %s2637_s18, 4  ;;  %s561_s23 = sshll.u32 %s3267_s14, 4  ;;  %s519_s27 = int_to_ptr.vmem [resolvable:$true] %s518_s27  ;;  %s562_s23 = int_to_ptr.hbm [resolvable:$true] %s561_s23 }
  0x2d   : > { %2213 = dma.hbm_to_vmem [thread:$0]  (!%p2815_p12), %s517_s12, 32, %s519_s27, [#allocation6], %s2633_s25, %s2633_s25, %s2634_s26  }
  0x2e   : > { %s2638_s29 = smov [#allocation10]   ;;  %s2639_s1 = smov [#allocation11]  }
  0x2f   : > { %s549_s2 = sshll.u32 %s2638_s29, 4  ;;  %s563_s19 = sshll.u32 %s2639_s1, 4  ;;  %s550_s2 = int_to_ptr.vmem [resolvable:$true] %s549_s2  ;;  %s564_s19 = int_to_ptr.vmem [resolvable:$true] %s563_s19 }
  0x30   : > { %2219 = dma.hbm_to_vmem [thread:$0]  (!%p2815_p12), %s548_s20, 32, %s550_s2, [#allocation9], %s2633_s25, %s2633_s25, %s2634_s26  }
  0x31   : > { %2222 = dma.hbm_to_vmem [thread:$0]  (!%p2815_p12), %s562_s23, 32, %s564_s19, [#allocation12], %s2633_s25, %s2633_s25, %s2634_s26  }
  0x32   : > { %592 = sbr.rel (%p2804_p10) target bundleno = 5136 (0x1410), region = 88 }
  0x37   : > { %2593 = dma.done.wait (%p2230_p9), [#allocation3], 128  }
  0x38   : > { %2595 = vsyncadd (%p2230_p9), [#allocation3], 4294967168 }
  0x39   : > { %2597 = dma.done.wait (%p2230_p9), [#allocation6], 64  }
  0x3a   : > { %2599 = vsyncadd (%p2230_p9), [#allocation6], 4294967232 }
  0x3b   : > { %2601 = dma.done.wait (%p2230_p9), [#allocation9], 64  }
  0x3c   : > { %2603 = vsyncadd (%p2230_p9), [#allocation9], 4294967232 }
  0x3d   : > { %2605 = dma.done.wait (%p2230_p9), [#allocation12], 32  }
  0x3e   : > { %2607 = vsyncadd (%p2230_p9), [#allocation12], 4294967264  ;;  %p675_p13 = scmp.lt.s32.totalorder %s2776_s0, 1  ;;  %vm689_vm0 = vcmask 1045504   ;;  %s3308_s26 = sld [smem:[#allocation31_spill]]  ;;  %vm685_vm1 = vcmask 48128  }
  0x3f   : > { %v680_v0 = vld [vmem:[#allocation2] sm:$0x3f]  ;;  %v716_v2 = vld [vmem:[%s3256_s3 + $0x18] sm:$0xff]  ;;  %v715_v3 = vld [vmem:[%s3256_s3 + $0x10] sm:$0xff]  ;;  %s3309_s19 = sld [smem:[#allocation33_spill]]  ;;  %vm721_vm2 = vcmask 261120  }
  0x40   : > { %s676_s12 = scalar_select %p675_p13, %s2776_s0, 1  ;;  %2093 = vmatpush.msk.msra.mxu0 %vm689_vm0, %v680_v0  ;;  %737 = vmatpush.msra.mxu1 %v716_v2  ;;  %v714_v4 = vld [vmem:[%s3256_s3 + $0x8] sm:$0xff]  ;;  %v713_v5 = vld [vmem:[%s3256_s3] sm:$0xff]  ;;  %vm753_vm3 = vcmask 64512   ;;  %vm1204_vm8 = vcmask 523264  }
  0x41   : > { %v2304_v9 = vld [vmem:[%s3257_s4] ss:$0 sm:$0xff]  ;;  %s2640_s24 = smov 88   ;;  %s2641_s25 = smov 96   ;;  %v746_v2 = vld [vmem:[%s3258_s5 + $0x8] sm:$0xff] }
  0x42   : > { %s2092_s22 = sshll.u32 %s676_s12, 3  ;;  %738 = vmatpush.msra.mxu1 %v715_v3  ;;  %s3283_s27 = smov 112   ;;  %v745_v12 = vld [vmem:[%s3258_s5] sm:$0xff] }
  0x43   : > { %s3286_s30 = smov 72   ;;  %835 = vmatpush.msrb.mxu0 %v745_v12  ;;  %s3284_s8 = smov 56   ;;  %v2305_v12 = vld [vmem:[%s3259_s6] ss:$0 sm:$0xff] }
  0x44   : > { %s678_s18 = scalar_lea.vmem %s3308_s26, %s2092_s22  ;;  %739 = vmatpush.msra.mxu1 %v714_v4  ;;  %s2642_s26 = smov 120  }
  0x45   : > { %v679_v1 = vld [vmem:[%s678_s18] sm:$0xff]  ;;  %s2643_s18 = smov 80   ;;  %s2647_s17 = smov 64  }
  0x46   : > { %2094 = vmatmul.msk.f32.vlgmr.msra.gmra.mxu0 %vm685_vm1, %v679_v1  ;;  %740 = vmatpush.msra.mxu1 %v713_v5  ;;  %v2303_v6 = vld [vmem:[%s3309_s19] ss:$0 sm:$0xff]  ;;  %s3285_s23 = smov 104   ;;  %s2937_s29 = sand.u32 1, %s2622_s28  }
  0x47   : > { %s2091_s2 = sshll.u32 %s2937_s29, 6  ;;  %s3281_s19 = smov 40  }
  0x48   : > { %s2940_s1 = scalar_lea.vmem [#allocation14], %s2091_s2  ;;  %s3282_s12 = smov 48  }
  0x49   : > { %s3313_s22 = smov 112   ;;  %s3315_s20 = smov 40  }
  0x4a   : > { %s667_s2 = scalar_lea.vmem [#allocation13], %s2937_s29 }
  0xc3   : > { %v710_v7 = vpop.f32.mrf.mxu0 }
  0xc4   : > { %v2899_v8 = vadd.f32 %v2303_v6, %v710_v7 }
  0xc6   : > { %2095 = vmatmul.msk.f32.vlgmr.msra.gmra.mxu1 %vm721_vm2, %v2899_v8 }
 0x143   : > { %v742_v10 = vpop.f32.mrf.mxu1 }
 0x144   : > { %v2906_v11 = vadd.f32 %v2304_v9, %v742_v10  ;;  %v748_v9 = vld [vmem:[%s3258_s5 + $0x18] sm:$0xff] }
 0x146   : > { %846 = vrot.lane.b32.xlu2 %v2906_v11, %s2640_s24  ;;  %751 = vrot.lane.b32.xlu0 %v2906_v11, %s2641_s25 }
 0x14e   : > { %844 = vrot.lane.b32.xlu2 %v2906_v11, %s2642_s26 }
 0x156   : > { %938 = vrot.lane.b32.xlu2 %v2906_v11, %s2643_s18 }
 0x15e   : > { %936 = vrot.lane.b32.xlu2 %v2906_v11, %s3283_s27  ;;  %s1885_s27 = sshll.u32 %s667_s2, 4  ;;  %s1886_s27 = int_to_ptr.vmem [resolvable:$true] %s1885_s27 }
 0x166   : > { %1030 = vrot.lane.b32.xlu2 %v2906_v11, %s3286_s30 }
 0x1a0   : > { %v847_v13 = vpop.permute.xlu2 %846 }
 0x1a8   : > { %v845_v14 = vpop.permute.xlu2 %844 }
 0x1b0   : > { %v939_v15 = vpop.permute.xlu2 %938 }
 0x1b1   : > { %2105 = vmatpush.xpose.msk.msra.mxu0 %vm753_vm3, %v939_v15 }
 0x1b8   : > { %v937_v16 = vpop.permute.xlu2 %936  ;;  %v752_v17 = vpop.permute.xlu0 %751 }
 0x1b9   : > { %2096 = vmatpush.xpose.msk.msra.mxu2 %vm753_vm3, %v752_v17 }
 0x1bc   : > { %2097 = vmatmul.msk.f32.vlgmr.msra.gmra.mxu2 %vm753_vm3, %v2906_v11 }
 0x1c0   : > { %v1031_v18 = vpop.permute.xlu2 %1030 }
 0x1c1   : > { %2110 = vmatpush.xpose.msk.msrb.mxu1 %vm753_vm3, %v1031_v18 }
 0x23f   : > { %v775_v19 = vpop.f32.mrf.mxu2 }
 0x240   : > { %v778_v20 = vmul.f32 0.35355338, %v775_v19 }
 0x242   : > { %v779_v21 = vsel %vm753_vm3, %v778_v20, -inf }
 0x243   : > { %780 = vmax.xlane.f32.xlu0 %v779_v21 }
 0x257   : > { %886 = vrot.lane.b32.xlu0 %v2906_v11, %s3284_s8 }
 0x2b6   : > { %v781_v22 = vpop.xlane.xlu0 %780 }
 0x2b7   : > { %v782_v23 = vsub.f32 %v778_v20, %v781_v22 }
 0x2b9   : > { %v783_v24 = vmul.f32 1.442695, %v782_v23  ;;  %v2651_v23 = vmov 32.0  }
 0x2bb   : > { %2320 = vpow2.f32 %v783_v24 }
 0x2c1   : > { %v2321_v25 = vpop.eup %2320 }
 0x2c2   : > { %v785_v26 = vsel %vm753_vm3, %v2321_v25, 0.0 }
 0x2c3   : > { %786 = vadd.xlane.f32.xlu1 %v785_v26 }
 0x2c9   : > { %v887_v27 = vpop.permute.xlu0 %886 }
 0x2ca   : > { %907 = vmatpush.msrb.mxu2 %v887_v27 }
 0x2dc   : > { %791 = vrot.lane.b32.xlu1 %v2906_v11, %s2647_s17 }
 0x2e4   : > { %1028 = vrot.lane.b32.xlu1 %v2906_v11, %s3285_s23 }
 0x336   : > { %v787_v28 = vpop.xlane.xlu1 %786 }
 0x337   : > { %2322 = vrcp.f32 %v787_v28 }
 0x33d   : > { %v2323_v29 = vpop.eup %2322 }
 0x33e   : > { %v789_v30 = vmul.f32 %v2323_v29, %v2321_v25 }
 0x340   : > { %790 = vst.msk [vmem:[%s2940_s1] sm:$0xff] %vm753_vm3, %v789_v30 }
 0x34e   : > { %v792_v31 = vpop.permute.xlu1 %791 }
 0x34f   : > { %812 = vmatpush.msra.mxu3 %v792_v31 }
 0x350   : > { %2098 = vmatmul.msk.f32.vlgmr.msra.gmra.mxu3 %vm753_vm3, %v789_v30 }
 0x351   : > { %2100 = vmatpush.xpose.msk.msrb.mxu3 %vm753_vm3, %v847_v13 }
 0x355   : > { %930 = vmatpush.msra.mxu3 %v746_v2 }
 0x356   : > { %v1029_v32 = vpop.permute.xlu1 %1028 }
 0x357   : > { %2111 = vmatmul.msk.f32.vlgmr.msrb.gmra.mxu1 %vm753_vm3, %v1029_v32 }
 0x358   : > { %2101 = vmatmul.msk.f32.vlgmr.msrb.gmra.mxu3 %vm753_vm3, %v845_v14 }
 0x3d3   : > { %v814_v33 = vpop.f32.mrf.mxu3 }
 0x3d4   : > { %2099 = vmatmul.msk.f32.vlgmr.msrb.gmra.mxu0 %vm753_vm3, %v814_v33  ;;  %v1053_v37 = vpop.f32.mrf.mxu1 }
 0x3d5   : > { %v1056_v38 = vmul.f32 0.35355338, %v1053_v37  ;;  %v1160_v37 = vld [vmem:[%s3262_s9] sm:$0xff] }
 0x3d7   : > { %v1057_v39 = vsel %vm753_vm3, %v1056_v38, -inf }
 0x3db   : > { %v869_v34 = vpop.f32.mrf.mxu3 }
 0x3dc   : > { %v872_v35 = vmul.f32 0.35355338, %v869_v34  ;;  %2106 = vmatmul.msk.f32.vlgmr.msra.gmra.mxu0 %vm753_vm3, %v937_v16  ;;  %v1163_v34 = vld [vmem:[%s3262_s9 + $0x18] sm:$0xff] }
 0x3de   : > { %v873_v36 = vsel %vm753_vm3, %v872_v35, -inf }
 0x3df   : > { %874 = vmax.xlane.f32.xlu2 %v873_v36  ;;  %v1161_v36 = vld [vmem:[%s3262_s9 + $0x8] sm:$0xff] }
 0x3e7   : > { %1058 = vmax.xlane.f32.xlu2 %v1057_v39  ;;  %v1198_v39 = vld [vmem:[%s3264_s11 + $0x30] sm:$0xff] }
 0x451   : > { %v2952_v40 = vpop.f32.mrf.mxu0 }
 0x452   : > { %v875_v41 = vpop.xlane.xlu2 %874  ;;  %v843_v13 = vadd.f32 %v2305_v12, %v2952_v40  ;;  %v1197_v40 = vld [vmem:[%s3264_s11 + $0x28] sm:$0xff]  ;;  %v2120_v12 = vld [vmem:[%s3256_s3 + $0x38] sm:$0xff] }
 0x453   : > { %v876_v42 = vsub.f32 %v872_v35, %v875_v41  ;;  %v1162_v35 = vld [vmem:[%s3262_s9 + $0x10] sm:$0xff] }
 0x455   : > { %v877_v43 = vmul.f32 1.442695, %v876_v42 }
 0x457   : > { %2324 = vpow2.f32 %v877_v43  ;;  %v1196_v43 = vld [vmem:[%s3264_s11 + $0x20] sm:$0xff] }
 0x459   : > { %v961_v44 = vpop.f32.mrf.mxu0 }
 0x45a   : > { %v964_v45 = vmul.f32 0.35355338, %v961_v44  ;;  %v1059_v46 = vpop.xlane.xlu2 %1058 }
 0x45b   : > { %v1060_v47 = vsub.f32 %v1056_v38, %v1059_v46  ;;  %v1199_v38 = vld [vmem:[%s3264_s11 + $0x38] sm:$0xff] }
 0x45c   : > { %v965_v48 = vsel %vm753_vm3, %v964_v45, -inf  ;;  %1216 = vmatpush.msra.mxu1 %v1199_v38 }
 0x45d   : > { %v2325_v49 = vpop.eup %2324  ;;  %v1061_v50 = vmul.f32 1.442695, %v1060_v47  ;;  %966 = vmax.xlane.f32.xlu0 %v965_v48 }
 0x45e   : > { %v879_v51 = vsel %vm753_vm3, %v2325_v49, 0.0  ;;  %1217 = vmatpush.msra.mxu1 %v1198_v39 }
 0x45f   : > { %2326 = vpow2.f32 %v1061_v50  ;;  %880 = vadd.xlane.f32.xlu1 %v879_v51 }
 0x460   : > { %1218 = vmatpush.msra.mxu1 %v1197_v40 }
 0x462   : > { %1219 = vmatpush.msra.mxu1 %v1196_v43  ;;  %v2123_v43 = vld [vmem:[%s3258_s5 + $0x20] sm:$0xff] }
 0x465   : > { %v2327_v52 = vpop.eup %2326 }
 0x466   : > { %v1063_v53 = vsel %vm753_vm3, %v2327_v52, 0.0 }
 0x467   : > { %1064 = vadd.xlane.f32.xlu2 %v1063_v53 }
 0x47f   : > { %1070 = vrot.lane.b32.xlu2 %v2906_v11, %s3281_s19  ;;  %s3316_s19 = sld [smem:[#allocation36_spill]] }
 0x4d0   : > { %v967_v54 = vpop.xlane.xlu0 %966 }
 0x4d1   : > { %v968_v55 = vsub.f32 %v964_v45, %v967_v54  ;;  %v1195_v45 = vld [vmem:[%s3264_s11 + $0x18] sm:$0xff] }
 0x4d2   : > { %v881_v56 = vpop.xlane.xlu1 %880  ;;  %1220 = vmatpush.msra.mxu1 %v1195_v45 }
 0x4d3   : > { %v969_v57 = vmul.f32 1.442695, %v968_v55  ;;  %2328 = vrcp.f32 %v881_v56  ;;  %v2307_v55 = vld [vmem:[#allocation5] ss:$0 sm:$0xff] }
 0x4d5   : > { %2330 = vpow2.f32 %v969_v57 }
 0x4d9   : > { %v2329_v58 = vpop.eup %2328 }
 0x4da   : > { %v1065_v59 = vpop.xlane.xlu2 %1064  ;;  %v883_v60 = vmul.f32 %v2329_v58, %v2325_v49  ;;  %v1194_v58 = vld [vmem:[%s3264_s11 + $0x10] sm:$0xff] }
 0x4db   : > { %v2331_v61 = vpop.eup %2330  ;;  %2332 = vrcp.f32 %v1065_v59  ;;  %1221 = vmatpush.msra.mxu1 %v1194_v58  ;;  %v1193_v59 = vld [vmem:[%s3264_s11 + $0x8] sm:$0xff] }
 0x4dc   : > { %2103 = vmatmul.msk.f32.vlgmr.msrb.gmra.mxu2 %vm753_vm3, %v883_v60  ;;  %v971_v62 = vsel %vm753_vm3, %v2331_v61, 0.0  ;;  %2102 = vst.msk [vmem:[%s2940_s1 + $0x8] sm:$0xff] %vm753_vm3, %v883_v60  ;;  %v1192_v60 = vld [vmem:[%s3264_s11] sm:$0xff] }
 0x4dd   : > { %972 = vadd.xlane.f32.xlu1 %v971_v62  ;;  %1222 = vmatpush.msra.mxu1 %v1193_v59 }
 0x4df   : > { %1223 = vmatpush.msra.mxu1 %v1192_v60 }
 0x4e1   : > { %v2333_v63 = vpop.eup %2332 }
 0x4e2   : > { %v1067_v0 = vmul.f32 %v2333_v63, %v2327_v52  ;;  %v1071_v1 = vpop.permute.xlu2 %1070  ;;  %v2306_v52 = vld [vmem:[%s3260_s7] ss:$0 sm:$0xff] }
 0x4e3   : > { %1091 = vmatpush.msrb.mxu0 %v1071_v1  ;;  %v2309_v1 = vld [vmem:[#allocation8] ss:$0 sm:$0xff] }
 0x4e4   : > { %2113 = vmatmul.msk.f32.vlgmr.msrb.gmra.mxu0 %vm753_vm3, %v1067_v0  ;;  %2112 = vst.msk [vmem:[%s2940_s1 + $0x18] sm:$0xff] %vm753_vm3, %v1067_v0 }
 0x4e5   : > { %1286 = vmatpush.msra.mxu0 %v2120_v12 }
 0x4f6   : > { %978 = vrot.lane.b32.xlu1 %v2906_v11, %s3282_s12  ;;  %v747_v11 = vld [vmem:[%s3258_s5 + $0x10] sm:$0xff]  ;;  %s3314_s12 = smov 48  }
 0x4f7   : > { %1022 = vmatpush.msra.mxu2 %v747_v11 }
 0x4f9   : > { %1183 = vmatpush.msrb.mxu2 %v1163_v34 }
 0x4fb   : > { %1184 = vmatpush.msrb.mxu2 %v1162_v35 }
 0x4fd   : > { %1185 = vmatpush.msrb.mxu2 %v1161_v36 }
 0x4ff   : > { %1186 = vmatpush.msrb.mxu2 %v1160_v37 }
 0x550   : > { %v973_v3 = vpop.xlane.xlu1 %972 }
 0x551   : > { %2334 = vrcp.f32 %v973_v3 }
 0x552   : > { %2336 = vrcp.f32 %v2651_v23 }
 0x557   : > { %v2335_v4 = vpop.eup %2334 }
 0x558   : > { %v975_v5 = vmul.f32 %v2335_v4, %v2331_v61  ;;  %v2337_v24 = vpop.eup %2336  ;;  %v2308_v61 = vld [vmem:[#allocation7] ss:$0 sm:$0xff] }
 0x559   : > { %v1127_v25 = vmul.f32 32.0, %v2337_v24  ;;  %vm1131_vm4 = vweird.f32 %v2337_v24 }
 0x55a   : > { %2107 = vst.msk [vmem:[%s2940_s1 + $0x10] sm:$0xff] %vm753_vm3, %v975_v5 }
 0x55b   : > { %v1128_v26 = vsub.f32 1.0, %v1127_v25  ;;  %v2310_v25 = vld [vmem:[#allocation10] ss:$0 sm:$0xff] }
 0x55d   : > { %v1129_v27 = vmul.f32 %v2337_v24, %v1128_v26 }
 0x55f   : > { %v909_v6 = vpop.f32.mrf.mxu2  ;;  %v1130_v28 = vadd.f32 %v2337_v24, %v1129_v27 }
 0x560   : > { %2104 = vmatmul.msk.f32.vlgmr.msra.gmra.mxu3 %vm753_vm3, %v909_v6 }
 0x561   : > { %v1093_v10 = vpop.f32.mrf.mxu0  ;;  %v2989_v29 = vsel %vm1131_vm4, %v2337_v24, %v1130_v28  ;;  %v2311_v28 = vld [vmem:[#allocation11] ss:$0 sm:$0xff]  ;;  %vm1855_vm4 = vcmask 32768  }
 0x568   : > { %v979_v7 = vpop.permute.xlu1 %978 }
 0x569   : > { %999 = vmatpush.msrb.mxu3 %v979_v7 }
 0x56a   : > { %2108 = vmatmul.msk.f32.vlgmr.msrb.gmra.mxu3 %vm753_vm3, %v975_v5 }
 0x56b   : > { %1114 = vmatpush.msra.mxu3 %v748_v9 }
 0x572   : > { %2114 = vmatmul.msk.f32.vlgmr.msra.gmra.mxu3 %vm753_vm3, %v1093_v10 }
 0x5e3   : > { %v932_v14 = vpop.f32.mrf.mxu3 }
 0x5e4   : > { %v935_v15 = vadd.f32 %v932_v14, %v843_v13  ;;  %v2119_v13 = vld [vmem:[%s3256_s3 + $0x30] sm:$0xff]  ;;  %v2118_v14 = vld [vmem:[%s3256_s3 + $0x28] sm:$0xff] }
 0x5e5   : > { %1287 = vmatpush.msra.mxu0 %v2119_v13 }
 0x5e7   : > { %1288 = vmatpush.msra.mxu0 %v2118_v14 }
 0x5ed   : > { %v1001_v16 = vpop.f32.mrf.mxu3 }
 0x5ee   : > { %2109 = vmatmul.msk.f32.vlgmr.msra.gmra.mxu2 %vm753_vm3, %v1001_v16 }
 0x5f5   : > { %v1116_v19 = vpop.f32.mrf.mxu3 }
 0x671   : > { %v1024_v17 = vpop.f32.mrf.mxu2 }
 0x672   : > { %v1027_v18 = vadd.f32 %v1024_v17, %v935_v15  ;;  %v2117_v15 = vld [vmem:[%s3256_s3 + $0x20] sm:$0xff] }
 0x673   : > { %1289 = vmatpush.msra.mxu0 %v2117_v15 }
 0x674   : > { %v1119_v20 = vadd.f32 %v1116_v19, %v1027_v18 }
 0x675   : > { %1386 = vmatpush.msrb.mxu0 %v2123_v43 }
 0x676   : > { %v1120_v21 = vadd.f32 %v1119_v20, %v2899_v8 }
 0x678   : > { %v1123_v22 = vsel %vm721_vm2, %v1120_v21, 0.0 }
 0x679   : > { %1124 = vadd.xlane.f32.xlu0 %v1123_v22 }
 0x6ec   : > { %v1125_v30 = vpop.xlane.xlu0 %1124 }
 0x6ed   : > { %v1133_v31 = vmul.f32 %v2989_v29, %v1125_v30 }
 0x6ef   : > { %v1134_v32 = vsub.f32 %v1120_v21, %v1133_v31 }
 0x6f1   : > { %v1135_v33 = vmul.f32 %v1134_v32, %v1134_v32 }
 0x6f3   : > { %v1136_v8 = vsel %vm721_vm2, %v1135_v33, 0.0 }
 0x6f4   : > { %1137 = vadd.xlane.f32.xlu1 %v1136_v8 }
 0x767   : > { %v1138_v41 = vpop.xlane.xlu1 %1137 }
 0x768   : > { %v1139_v42 = vmul.f32 %v1138_v41, %v2989_v29 }
 0x76a   : > { %v1140_v44 = vadd.f32 1e-05, %v1139_v42 }
 0x76c   : > { %2338 = vrsqrt.f32 %v1140_v44  ;;  %vm1147_vm6 = vweird.f32 %v1140_v44 }
 0x772   : > { %v2339_v46 = vpop.eup %2338 }
 0x773   : > { %v1142_v47 = vmul.f32 %v2339_v46, %v1140_v44  ;;  %vm1148_vm5 = vweird.f32 %v2339_v46 }
 0x774   : > { %vm1149_vm7 = vmor %vm1147_vm6, %vm1148_vm5 }
 0x775   : > { %v1143_v48 = vmul.f32 %v2339_v46, %v1142_v47 }
 0x777   : > { %v1144_v49 = vmul.f32 0.5, %v1143_v48 }
 0x779   : > { %v1145_v50 = vsub.f32 1.5, %v1144_v49 }
 0x77b   : > { %v1146_v51 = vmul.f32 %v2339_v46, %v1145_v50 }
 0x77d   : > { %v1150_v53 = vsel %vm1149_vm7, %v2339_v46, %v1146_v51  ;;  %v2124_v46 = vld [vmem:[%s3258_s5 + $0x28] sm:$0xff] }
 0x77e   : > { %v1151_v54 = vmul.f32 %v1150_v53, %v1134_v32  ;;  %v2312_v32 = vld [vmem:[%s3257_s4 + $0x1] ss:$0 sm:$0xff]  ;;  %1481 = vmatpush.msrb.mxu1 %v2124_v46 }
 0x780   : > { %v1155_v56 = vmul.f32 %v2306_v52, %v1151_v54 }
 0x782   : > { %v1159_v57 = vadd.f32 %v2307_v55, %v1155_v56 }
 0x784   : > { %2115 = vmatmul.msk.f32.vlgmr.msrb.gmra.mxu2 %vm721_vm2, %v1159_v57 }
 0x807   : > { %v1188_v62 = vpop.f32.mrf.mxu2 }
 0x808   : > { %v1189_v63 = vadd.f32 %v2308_v61, %v1188_v62 }
 0x80a   : > { %v1191_v0 = vmax.f32 %v1189_v63, 0.0 }
 0x80c   : > { %2116 = vmatmul.msk.f32.vlgmr.msra.gmra.mxu1 %vm1204_vm8, %v1191_v0 }
 0x889   : > { %v1225_v2 = vpop.f32.mrf.mxu1 }
 0x88a   : > { %v1226_v3 = vadd.f32 %v2309_v1, %v1225_v2 }
 0x88c   : > { %v1228_v4 = vadd.f32 %v1226_v3, %v1159_v57 }
 0x88e   : > { %v1231_v5 = vsel %vm721_vm2, %v1228_v4, 0.0 }
 0x88f   : > { %1232 = vadd.xlane.f32.xlu0 %v1231_v5 }
 0x902   : > { %v1233_v6 = vpop.xlane.xlu0 %1232 }
 0x903   : > { %v1234_v7 = vmul.f32 %v1233_v6, %v2989_v29 }
 0x905   : > { %v1235_v9 = vsub.f32 %v1228_v4, %v1234_v7 }
 0x907   : > { %v1236_v10 = vmul.f32 %v1235_v9, %v1235_v9 }
 0x909   : > { %v1237_v11 = vsel %vm721_vm2, %v1236_v10, 0.0  ;;  %v2313_v10 = vld [vmem:[%s3259_s6 + $0x1] ss:$0 sm:$0xff] }
 0x90a   : > { %1238 = vadd.xlane.f32.xlu2 %v1237_v11 }
 0x97d   : > { %v1239_v16 = vpop.xlane.xlu2 %1238 }
 0x97e   : > { %v1240_v17 = vmul.f32 %v1239_v16, %v2989_v29 }
 0x980   : > { %v1241_v18 = vadd.f32 1e-05, %v1240_v17 }
 0x982   : > { %2340 = vrsqrt.f32 %v1241_v18  ;;  %vm1248_vm10 = vweird.f32 %v1241_v18 }
 0x988   : > { %v2341_v19 = vpop.eup %2340 }
 0x989   : > { %v1243_v20 = vmul.f32 %v2341_v19, %v1241_v18  ;;  %vm1249_vm9 = vweird.f32 %v2341_v19 }
 0x98a   : > { %vm1250_vm11 = vmor %vm1248_vm10, %vm1249_vm9 }
 0x98b   : > { %v1244_v21 = vmul.f32 %v2341_v19, %v1243_v20 }
 0x98d   : > { %v1245_v22 = vmul.f32 0.5, %v1244_v21 }
 0x98f   : > { %v1246_v23 = vsub.f32 1.5, %v1245_v22 }
 0x991   : > { %v1247_v24 = vmul.f32 %v2341_v19, %v1246_v23 }
 0x993   : > { %v1251_v26 = vsel %vm1250_vm11, %v2341_v19, %v1247_v24 }
 0x994   : > { %v1252_v27 = vmul.f32 %v1251_v26, %v1235_v9 }
 0x996   : > { %v1256_v30 = vmul.f32 %v2310_v25, %v1252_v27 }
 0x998   : > { %v3051_v31 = vadd.f32 %v2311_v28, %v1256_v30 }
 0x99a   : > { %2122 = vmatmul.msk.f32.vlgmr.msra.gmra.mxu0 %vm721_vm2, %v3051_v31 }
 0xa17   : > { %v1291_v33 = vpop.f32.mrf.mxu0 }
 0xa18   : > { %v3058_v8 = vadd.f32 %v2312_v32, %v1291_v33 }
 0xa1a   : > { %1302 = vrot.lane.b32.xlu0 %v3058_v8, %s2641_s25 }
 0xa22   : > { %1397 = vrot.lane.b32.xlu0 %v3058_v8, %s2640_s24  ;;  %s3310_s24 = smov 72  }
 0xa2a   : > { %1395 = vrot.lane.b32.xlu0 %v3058_v8, %s2642_s26 }
 0xa8c   : > { %v1303_v34 = vpop.permute.xlu0 %1302 }
 0xa8d   : > { %2128 = vmatpush.xpose.msk.msrb.mxu3 %vm753_vm3, %v1303_v34 }
 0xa90   : > { %2129 = vmatmul.msk.f32.vlgmr.msrb.gmra.mxu3 %vm753_vm3, %v3058_v8 }
 0xa94   : > { %v1398_v35 = vpop.permute.xlu0 %1397 }
 0xa95   : > { %2133 = vmatpush.xpose.msk.msra.mxu3 %vm753_vm3, %v1398_v35 }
 0xa9c   : > { %v1396_v36 = vpop.permute.xlu0 %1395 }
 0xa9d   : > { %2134 = vmatmul.msk.f32.vlgmr.msra.gmra.mxu3 %vm753_vm3, %v1396_v36 }
 0xb13   : > { %v1325_v37 = vpop.f32.mrf.mxu3 }
 0xb14   : > { %v1328_v38 = vmul.f32 0.35355338, %v1325_v37 }
 0xb16   : > { %v1329_v39 = vsel %vm753_vm3, %v1328_v38, -inf }
 0xb17   : > { %1330 = vmax.xlane.f32.xlu1 %v1329_v39 }
 0xb20   : > { %v1420_v40 = vpop.f32.mrf.mxu3 }
 0xb21   : > { %v1423_v41 = vmul.f32 0.35355338, %v1420_v40 }
 0xb23   : > { %v1424_v42 = vsel %vm753_vm3, %v1423_v41, -inf }
 0xb24   : > { %1425 = vmax.xlane.f32.xlu2 %v1424_v42 }
 0xb3c   : > { %1342 = vrot.lane.b32.xlu2 %v3058_v8, %s2647_s17  ;;  %s3312_s17 = smov 56  }
 0xb44   : > { %1489 = vrot.lane.b32.xlu2 %v3058_v8, %s2643_s18  ;;  %s3311_s18 = smov 104  }
 0xb4c   : > { %1581 = vrot.lane.b32.xlu2 %v3058_v8, %s3310_s24  ;;  %s1870_s24 = scalar_lea.sflag [#allocation4], %s2937_s29 }
 0xb8a   : > { %v1331_v44 = vpop.xlane.xlu1 %1330 }
 0xb8b   : > { %v1332_v45 = vsub.f32 %v1328_v38, %v1331_v44  ;;  %v2126_v38 = vld [vmem:[%s3258_s5 + $0x38] sm:$0xff] }
 0xb8d   : > { %v1333_v47 = vmul.f32 1.442695, %v1332_v45 }
 0xb8f   : > { %2342 = vpow2.f32 %v1333_v47 }
 0xb95   : > { %v2343_v48 = vpop.eup %2342 }
 0xb96   : > { %v1335_v49 = vsel %vm753_vm3, %v2343_v48, 0.0 }
 0xb97   : > { %1336 = vadd.xlane.f32.xlu0 %v1335_v49  ;;  %v1426_v50 = vpop.xlane.xlu2 %1425 }
 0xb98   : > { %v1427_v51 = vsub.f32 %v1423_v41, %v1426_v50 }
 0xb9a   : > { %v1428_v52 = vmul.f32 1.442695, %v1427_v51  ;;  %v2152_v51 = vld [vmem:[%s3262_s9 + $0x38] sm:$0xff] }
 0xb9c   : > { %2344 = vpow2.f32 %v1428_v52  ;;  %v2150_v52 = vld [vmem:[%s3262_s9 + $0x28] sm:$0xff] }
 0xb9f   : > { %v1343_v53 = vpop.permute.xlu2 %1342 }
 0xba0   : > { %1363 = vmatpush.msra.mxu2 %v1343_v53  ;;  %v2149_v53 = vld [vmem:[%s3262_s9 + $0x20] sm:$0xff] }
 0xba2   : > { %v2345_v54 = vpop.eup %2344 }
 0xba3   : > { %v1430_v55 = vsel %vm753_vm3, %v2345_v54, 0.0 }
 0xba4   : > { %1431 = vadd.xlane.f32.xlu1 %v1430_v55  ;;  %v2160_v55 = vld [vmem:[%s3264_s11 + $0x70] sm:$0xff] }
 0xba7   : > { %v1490_v56 = vpop.permute.xlu2 %1489 }
 0xba8   : > { %2138 = vmatpush.xpose.msk.msra.mxu0 %vm753_vm3, %v1490_v56  ;;  %v2159_v56 = vld [vmem:[%s3264_s11 + $0x68] sm:$0xff] }
 0xbab   : > { %1579 = vrot.lane.b32.xlu0 %v3058_v8, %s3311_s18  ;;  %s2568_s18 = scalar_lea.hbm %s3316_s19, 2 }
 0xbaf   : > { %v1582_v57 = vpop.permute.xlu2 %1581 }
 0xbb0   : > { %2143 = vmatpush.xpose.msk.msra.mxu1 %vm753_vm3, %v1582_v57 }
 0xbbd   : > { %1437 = vrot.lane.b32.xlu1 %v3058_v8, %s3312_s17 }
 0xbc5   : > { %1487 = vrot.lane.b32.xlu1 %v3058_v8, %s3313_s22 }
 0xc0a   : > { %v1337_v58 = vpop.xlane.xlu0 %1336 }
 0xc0b   : > { %2346 = vrcp.f32 %v1337_v58 }
 0xc11   : > { %v2347_v59 = vpop.eup %2346 }
 0xc12   : > { %v1339_v60 = vmul.f32 %v2347_v59, %v2343_v48  ;;  %v2158_v59 = vld [vmem:[%s3264_s11 + $0x60] sm:$0xff] }
 0xc14   : > { %2131 = vmatmul.msk.f32.vlgmr.msra.gmra.mxu2 %vm753_vm3, %v1339_v60  ;;  %2130 = vst.msk [vmem:[%s2940_s1 + $0x20] sm:$0xff] %vm753_vm3, %v1339_v60 }
 0xc17   : > { %v1432_v61 = vpop.xlane.xlu1 %1431 }
 0xc18   : > { %2348 = vrcp.f32 %v1432_v61  ;;  %v2157_v61 = vld [vmem:[%s3264_s11 + $0x58] sm:$0xff] }
 0xc1d   : > { %v1580_v4 = vpop.permute.xlu0 %1579 }
 0xc1e   : > { %v2349_v62 = vpop.eup %2348 }
 0xc1f   : > { %v1434_v63 = vmul.f32 %v2349_v62, %v2345_v54  ;;  %v2161_v54 = vld [vmem:[%s3264_s11 + $0x78] sm:$0xff] }
 0xc21   : > { %2135 = vst.msk [vmem:[%s2940_s1 + $0x28] sm:$0xff] %vm753_vm3, %v1434_v63 }
 0xc2f   : > { %v1438_v0 = vpop.permute.xlu1 %1437 }
 0xc30   : > { %1458 = vmatpush.msrb.mxu2 %v1438_v0 }
 0xc31   : > { %2136 = vmatmul.msk.f32.vlgmr.msrb.gmra.mxu2 %vm753_vm3, %v1434_v63 }
 0xc37   : > { %v1488_v2 = vpop.permute.xlu1 %1487 }
 0xc97   : > { %v1365_v1 = vpop.f32.mrf.mxu2 }
 0xc98   : > { %2132 = vmatmul.msk.f32.vlgmr.msrb.gmra.mxu0 %vm753_vm3, %v1365_v1 }
 0xca0   : > { %2139 = vmatmul.msk.f32.vlgmr.msra.gmra.mxu0 %vm753_vm3, %v1488_v2 }
 0xcb4   : > { %v1460_v3 = vpop.f32.mrf.mxu2 }
 0xcb5   : > { %2137 = vmatmul.msk.f32.vlgmr.msrb.gmra.mxu1 %vm753_vm3, %v1460_v3 }
 0xcb6   : > { %1765 = vmatpush.msrb.mxu1 %v2161_v54 }
 0xcb8   : > { %1766 = vmatpush.msrb.mxu1 %v2160_v55 }
 0xcba   : > { %1767 = vmatpush.msrb.mxu1 %v2159_v56 }
 0xcbc   : > { %1768 = vmatpush.msrb.mxu1 %v2158_v59 }
 0xcbd   : > { %2144 = vmatmul.msk.f32.vlgmr.msra.gmra.mxu1 %vm753_vm3, %v1580_v4  ;;  %v2314_v4 = vld [vmem:[%s3260_s7 + $0x1] ss:$0 sm:$0xff] }
 0xcbe   : > { %1769 = vmatpush.msrb.mxu1 %v2157_v61  ;;  %v1831_v61 = vld [vmem:[%s3269_s16] sm:$0x1] }
 0xd15   : > { %v1388_v5 = vpop.f32.mrf.mxu0 }
 0xd16   : > { %v1394_v11 = vadd.f32 %v2313_v10, %v1388_v5 }
 0xd1d   : > { %v1512_v6 = vpop.f32.mrf.mxu0 }
 0xd1e   : > { %v1515_v7 = vmul.f32 0.35355338, %v1512_v6 }
 0xd20   : > { %v1516_v9 = vsel %vm753_vm3, %v1515_v7, -inf }
 0xd21   : > { %1517 = vmax.xlane.f32.xlu1 %v1516_v9 }
 0xd32   : > { %v1483_v12 = vpop.f32.mrf.mxu1 }
 0xd33   : > { %v1486_v13 = vadd.f32 %v1483_v12, %v1394_v11  ;;  %v2156_v11 = vld [vmem:[%s3264_s11 + $0x50] sm:$0xff]  ;;  %v2155_v12 = vld [vmem:[%s3264_s11 + $0x48] sm:$0xff] }
 0xd34   : > { %1770 = vmatpush.msrb.mxu1 %v2156_v11 }
 0xd36   : > { %1771 = vmatpush.msrb.mxu1 %v2155_v12 }
 0xd3a   : > { %v1604_v14 = vpop.f32.mrf.mxu1 }
 0xd3b   : > { %v1607_v15 = vmul.f32 0.35355338, %v1604_v14  ;;  %v2316_v14 = vld [vmem:[#allocation7 + $0x1] ss:$0 sm:$0xff] }
 0xd3d   : > { %v1608_v16 = vsel %vm753_vm3, %v1607_v15, -inf }
 0xd3e   : > { %1609 = vmax.xlane.f32.xlu2 %v1608_v16 }
 0xd56   : > { %1529 = vrot.lane.b32.xlu2 %v3058_v8, %s3314_s12 }
 0xd94   : > { %v1518_v17 = vpop.xlane.xlu1 %1517 }
 0xd95   : > { %v1519_v18 = vsub.f32 %v1515_v7, %v1518_v17  ;;  %v2315_v7 = vld [vmem:[#allocation5 + $0x1] ss:$0 sm:$0xff] }
 0xd97   : > { %v1520_v19 = vmul.f32 1.442695, %v1519_v18  ;;  %v2317_v18 = vld [vmem:[#allocation8 + $0x1] ss:$0 sm:$0xff] }
 0xd99   : > { %2350 = vpow2.f32 %v1520_v19 }
 0xd9f   : > { %v2351_v20 = vpop.eup %2350 }
 0xda0   : > { %v1522_v21 = vsel %vm753_vm3, %v2351_v20, 0.0 }
 0xda1   : > { %1523 = vadd.xlane.f32.xlu0 %v1522_v21 }
 0xdb1   : > { %v1610_v22 = vpop.xlane.xlu2 %1609 }
 0xdb2   : > { %v1611_v23 = vsub.f32 %v1607_v15, %v1610_v22 }
 0xdb4   : > { %v1612_v24 = vmul.f32 1.442695, %v1611_v23 }
 0xdb6   : > { %2352 = vpow2.f32 %v1612_v24 }
 0xdb9   : > { %v1530_v25 = vpop.permute.xlu2 %1529 }
 0xdba   : > { %1550 = vmatpush.msrb.mxu3 %v1530_v25 }
 0xdbc   : > { %v2353_v26 = vpop.eup %2352  ;;  %1665 = vmatpush.msra.mxu3 %v2126_v38 }
 0xdbd   : > { %v1614_v27 = vsel %vm753_vm3, %v2353_v26, 0.0 }
 0xdbe   : > { %1615 = vadd.xlane.f32.xlu1 %v1614_v27 }
 0xdd7   : > { %1621 = vrot.lane.b32.xlu1 %v3058_v8, %s3315_s20  ;;  %v2125_v8 = vld [vmem:[%s3258_s5 + $0x30] sm:$0xff]  ;;  %s1883_s20 = scalar_lea.hbm %s3316_s19, %s2776_s0 }
 0xdd8   : > { %1573 = vmatpush.msra.mxu2 %v2125_v8  ;;  %s1887_s8 = sshll.u32 %s1883_s20, 4  ;;  %s1888_s8 = int_to_ptr.hbm [resolvable:$true] %s1887_s8 }
 0xdd9   : > { %s2562_s25 = sshra.s32 %s1888_s8, 4  ;;  %s2563_s25 = int_to_ptr.hbm [resolvable:$true] %s2562_s25 }
 0xdda   : > { %1731 = vmatpush.msrb.mxu2 %v2152_v51  ;;  %s2564_s26 = scalar_lea.hbm %s2563_s25, 1  ;;  %p2569_p3 = scmp.lt.s32.totalorder %s2563_s25, %s3316_s19 }
 0xddb   : > { %p2565_p0 = scmp.ne.s32.totalorder %s2563_s25, %s2564_s26  ;;  %p2570_p4 = scmp.lt.s32.totalorder %s2568_s18, %s2564_s26 }
 0xddd   : > { %p2566_p1 = pnand %p2565_p0, %p2793_p5  ;;  %p2571_p7 = por %p2570_p4, %p2569_p3 }
 0xddf   : > { %p2567_p2 = pneg %p2566_p1 }
 0xde1   : > { %p2572_p8 = pnand %p2571_p7, %p2567_p2 }
 0xe14   : > { %v1524_v28 = vpop.xlane.xlu0 %1523 }
 0xe15   : > { %2354 = vrcp.f32 %v1524_v28 }
 0xe1b   : > { %v2355_v30 = vpop.eup %2354 }
 0xe1c   : > { %v1526_v32 = vmul.f32 %v2355_v30, %v2351_v20  ;;  %v1830_v30 = vld [vmem:[%s3268_s15 + $0x18] sm:$0xff] }
 0xe1e   : > { %2141 = vmatmul.msk.f32.vlgmr.msrb.gmra.mxu3 %vm753_vm3, %v1526_v32  ;;  %2140 = vst.msk [vmem:[%s2940_s1 + $0x30] sm:$0xff] %vm753_vm3, %v1526_v32  ;;  %v1829_v32 = vld [vmem:[%s3268_s15 + $0x10] sm:$0xff] }
 0xe31   : > { %v1616_v33 = vpop.xlane.xlu1 %1615 }
 0xe32   : > { %2356 = vrcp.f32 %v1616_v33 }
 0xe38   : > { %v2357_v34 = vpop.eup %2356 }
 0xe39   : > { %v1618_v35 = vmul.f32 %v2357_v34, %v2353_v26  ;;  %v1828_v34 = vld [vmem:[%s3268_s15 + $0x8] sm:$0xff] }
 0xe3b   : > { %2145 = vst.msk [vmem:[%s2940_s1 + $0x38] sm:$0xff] %vm753_vm3, %v1618_v35 }
 0xe49   : > { %v1622_v36 = vpop.permute.xlu1 %1621 }
 0xe4a   : > { %1642 = vmatpush.msrb.mxu0 %v1622_v36  ;;  %v1827_v36 = vld [vmem:[%s3268_s15] sm:$0xff] }
 0xe4b   : > { %2146 = vmatmul.msk.f32.vlgmr.msrb.gmra.mxu0 %vm753_vm3, %v1618_v35 }
 0xe4c   : > { %1847 = vmatpush.msra.mxu0 %v1830_v30 }
 0xe4e   : > { %1848 = vmatpush.msra.mxu0 %v1829_v32 }
 0xe50   : > { %1849 = vmatpush.msra.mxu0 %v1828_v34 }
 0xe52   : > { %1850 = vmatpush.msra.mxu0 %v1827_v36 }
 0xea1   : > { %v1552_v37 = vpop.f32.mrf.mxu3 }
 0xea2   : > { %2142 = vmatmul.msk.f32.vlgmr.msra.gmra.mxu2 %vm753_vm3, %v1552_v37 }
 0xec8   : > { %v1644_v39 = vpop.f32.mrf.mxu0 }
 0xec9   : > { %2147 = vmatmul.msk.f32.vlgmr.msra.gmra.mxu3 %vm753_vm3, %v1644_v39  ;;  %v2652_v39 = vmov 8.0  }
 0xf25   : > { %v1575_v40 = vpop.f32.mrf.mxu2 }
 0xf26   : > { %v1578_v41 = vadd.f32 %v1575_v40, %v1486_v13  ;;  %v2154_v13 = vld [vmem:[%s3264_s11 + $0x40] sm:$0xff] }
 0xf27   : > { %1772 = vmatpush.msrb.mxu1 %v2154_v13 }
 0xf4c   : > { %v1667_v42 = vpop.f32.mrf.mxu3 }
 0xf4d   : > { %v1670_v43 = vadd.f32 %v1667_v42, %v1578_v41 }
 0xf4f   : > { %v1671_v44 = vadd.f32 %v1670_v43, %v3051_v31  ;;  %v2151_v31 = vld [vmem:[%s3262_s9 + $0x30] sm:$0xff]  ;;  %v2318_v43 = vld [vmem:[#allocation10 + $0x1] ss:$0 sm:$0xff] }
 0xf50   : > { %1732 = vmatpush.msrb.mxu2 %v2151_v31 }
 0xf51   : > { %v1676_v45 = vsel %vm721_vm2, %v1671_v44, 0.0 }
 0xf52   : > { %1677 = vadd.xlane.f32.xlu0 %v1676_v45  ;;  %1733 = vmatpush.msrb.mxu2 %v2150_v52  ;;  %v2319_v45 = vld [vmem:[#allocation11 + $0x1] ss:$0 sm:$0xff] }
 0xf54   : > { %1734 = vmatpush.msrb.mxu2 %v2149_v53 }
 0xfc5   : > { %v1678_v46 = vpop.xlane.xlu0 %1677 }
 0xfc6   : > { %v1679_v47 = vmul.f32 %v1678_v46, %v2989_v29 }
 0xfc8   : > { %v1680_v48 = vsub.f32 %v1671_v44, %v1679_v47 }
 0xfca   : > { %v1681_v49 = vmul.f32 %v1680_v48, %v1680_v48 }
 0xfcc   : > { %v1682_v50 = vsel %vm721_vm2, %v1681_v49, 0.0 }
 0xfcd   : > { %1683 = vadd.xlane.f32.xlu2 %v1682_v50 }
0x1040   : > { %v1684_v57 = vpop.xlane.xlu2 %1683 }
0x1041   : > { %v1685_v58 = vmul.f32 %v1684_v57, %v2989_v29 }
0x1043   : > { %v1686_v60 = vadd.f32 1e-05, %v1685_v58 }
0x1045   : > { %2358 = vrsqrt.f32 %v1686_v60  ;;  %vm1693_vm13 = vweird.f32 %v1686_v60 }
0x104b   : > { %v2359_v62 = vpop.eup %2358 }
0x104c   : > { %v1688_v63 = vmul.f32 %v2359_v62, %v1686_v60  ;;  %vm1694_vm12 = vweird.f32 %v2359_v62 }
0x104d   : > { %vm1695_vm14 = vmor %vm1693_vm13, %vm1694_vm12 }
0x104e   : > { %v1689_v0 = vmul.f32 %v2359_v62, %v1688_v63 }
0x1050   : > { %v1690_v1 = vmul.f32 0.5, %v1689_v0 }
0x1052   : > { %v1691_v2 = vsub.f32 1.5, %v1690_v1 }
0x1054   : > { %v1692_v3 = vmul.f32 %v2359_v62, %v1691_v2 }
0x1056   : > { %v1696_v5 = vsel %vm1695_vm14, %v2359_v62, %v1692_v3 }
0x1057   : > { %v1697_v6 = vmul.f32 %v1696_v5, %v1680_v48 }
0x1059   : > { %v1701_v9 = vmul.f32 %v2314_v4, %v1697_v6 }
0x105b   : > { %v1705_v10 = vadd.f32 %v2315_v7, %v1701_v9 }
0x105d   : > { %2153 = vmatmul.msk.f32.vlgmr.msrb.gmra.mxu2 %vm721_vm2, %v1705_v10 }
0x10e0   : > { %v1736_v15 = vpop.f32.mrf.mxu2 }
0x10e1   : > { %v1737_v16 = vadd.f32 %v2316_v14, %v1736_v15 }
0x10e3   : > { %v1739_v17 = vmax.f32 %v1737_v16, 0.0 }
0x10e5   : > { %2162 = vmatmul.msk.f32.vlgmr.msrb.gmra.mxu1 %vm1204_vm8, %v1739_v17 }
0x1162   : > { %v1774_v19 = vpop.f32.mrf.mxu1 }
0x1163   : > { %v1775_v20 = vadd.f32 %v2317_v18, %v1774_v19 }
0x1165   : > { %v1777_v21 = vadd.f32 %v1775_v20, %v1705_v10 }
0x1167   : > { %v1782_v22 = vsel %vm721_vm2, %v1777_v21, 0.0 }
0x1168   : > { %1783 = vadd.xlane.f32.xlu0 %v1782_v22 }
0x11db   : > { %v1784_v23 = vpop.xlane.xlu0 %1783 }
0x11dc   : > { %v1785_v24 = vmul.f32 %v1784_v23, %v2989_v29 }
0x11de   : > { %v1786_v25 = vsub.f32 %v1777_v21, %v1785_v24 }
0x11e0   : > { %v1787_v26 = vmul.f32 %v1786_v25, %v1786_v25 }
0x11e2   : > { %v1788_v27 = vsel %vm721_vm2, %v1787_v26, 0.0 }
0x11e3   : > { %1789 = vadd.xlane.f32.xlu1 %v1788_v27 }
0x1256   : > { %v1790_v28 = vpop.xlane.xlu1 %1789 }
0x1257   : > { %v1791_v33 = vmul.f32 %v1790_v28, %v2989_v29 }
0x1259   : > { %v1792_v35 = vadd.f32 1e-05, %v1791_v33 }
0x125b   : > { %2360 = vrsqrt.f32 %v1792_v35  ;;  %vm1799_vm0 = vweird.f32 %v1792_v35 }
0x125c   : > { %2362 = vrcp.f32 %v2652_v39 }
0x1261   : > { %v2361_v8 = vpop.eup %2360 }
0x1262   : > { %v1794_v37 = vmul.f32 %v2361_v8, %v1792_v35  ;;  %vm1800_vm15 = vweird.f32 %v2361_v8  ;;  %v2363_v41 = vpop.eup %2362 }
0x1263   : > { %vm1801_vm1 = vmor %vm1799_vm0, %vm1800_vm15  ;;  %v1820_v47 = vmul.f32 8.0, %v2363_v41  ;;  %vm1824_vm3 = vweird.f32 %v2363_v41 }
0x1264   : > { %v1795_v38 = vmul.f32 %v2361_v8, %v1794_v37 }
0x1265   : > { %v1821_v50 = vsub.f32 1.0, %v1820_v47 }
0x1266   : > { %v1796_v29 = vmul.f32 0.5, %v1795_v38 }
0x1267   : > { %v1822_v52 = vmul.f32 %v2363_v41, %v1821_v50 }
0x1268   : > { %v1797_v40 = vsub.f32 1.5, %v1796_v29 }
0x1269   : > { %v1823_v55 = vadd.f32 %v2363_v41, %v1822_v52 }
0x126a   : > { %v1798_v42 = vmul.f32 %v2361_v8, %v1797_v40 }
0x126b   : > { %v1825_v58 = vsel %vm1824_vm3, %v2363_v41, %v1823_v55 }
0x126c   : > { %v1802_v44 = vsel %vm1801_vm1, %v2361_v8, %v1798_v42 }
0x126d   : > { %v1803_v46 = vmul.f32 %v1802_v44, %v1786_v25 }
0x126f   : > { %v1807_v48 = vmul.f32 %v2318_v43, %v1803_v46 }
0x1271   : > { %v1811_v49 = vadd.f32 %v2319_v45, %v1807_v48 }
0x1273   : > { %v1812_v51 = vsel %vm721_vm2, %v1811_v49, 0.0 }
0x1274   : > { %v1813_v31 = vrot.slane %v1812_v51, 4 }
0x1276   : > { %v1814_v53 = vadd.f32 %v1813_v31, %v1812_v51 }
0x1278   : > { %v1815_v54 = vrot.slane %v1814_v53, 2 }
0x127a   : > { %v1816_v56 = vadd.f32 %v1815_v54, %v1814_v53 }
0x127c   : > { %v1817_v57 = vrot.slane %v1816_v56, 1 }
0x127e   : > { %v1818_v59 = vadd.f32 %v1817_v57, %v1816_v56 }
0x1280   : > { %v1826_v60 = vmul.f32 %v1825_v58, %v1818_v59 }
0x1282   : > { %2163 = vmatmul.msk.f32.vlgmr.msra.gmra.mxu0 %vm721_vm2, %v1826_v60 }
0x12ff   : > { %v1852_v62 = vpop.f32.mrf.mxu0 }
0x1300   : > { %v1853_v63 = vadd.f32 %v1852_v62, %v1831_v61 }
0x1302   : > { %v1856_v0 = vsel %vm1855_vm4, %v1853_v63, -inf }
0x1303   : > { %1857 = vmax.xlane.f32.xlu0 %v1856_v0 }
0x1376   : > { %v1858_v1 = vpop.xlane.xlu0 %1857 }
0x1377   : > { %v1859_v2 = vsub.f32 %v1853_v63, %v1858_v1 }
0x1379   : > { %v1860_v3 = vmul.f32 1.442695, %v1859_v2 }
0x137b   : > { %2364 = vpow2.f32 %v1860_v3 }
0x1381   : > { %v2365_v4 = vpop.eup %2364 }
0x1382   : > { %v1862_v5 = vsel %vm1855_vm4, %v2365_v4, 0.0 }
0x1383   : > { %1863 = vadd.xlane.f32.xlu0 %v1862_v5 }
0x13f6   : > { %v1864_v6 = vpop.xlane.xlu0 %1863 }
0x13f7   : > { %2366 = vlog2.f32 %v1864_v6 }
0x13fd   : > { %v2367_v7 = vpop.eup %2366 }
0x13fe   : > { %v1866_v9 = vmul.f32 0.6931472, %v2367_v7 }
0x1400   : > { %v1867_v10 = vsub.f32 %v1859_v2, %v1866_v9 }
0x1402   : > { %1868 = vst.msk [vmem:[%s667_s2] sm:$0x1] %vm1855_vm4, %v1867_v10 }
0x1403   : > { %2575 = shalt.err (!%p2572_p8)
}
0x1404   : > { %2194 = dma.vmem_to_hbm [thread:$0]  (%p2793_p5), %s1886_s27, 16, %s1888_s8, %s1870_s24  }
0x1405   : > { %s1874_s21 = scalar_lea.sflag [#allocation15], %s2937_s29 }
0x1406   : > { %s2169_s20 = sshll.u32 %s2776_s0, 5  ;;  %s1909_s2 = sshll.u32 %s2940_s1, 4  ;;  %s1910_s2 = int_to_ptr.vmem [resolvable:$true] %s1909_s2 }
0x1407   : > { %s3318_s30 = sld [smem:[#allocation37_spill]]  ;;  %s2653_s27 = smov 512  }
0x1408   : > { %2195 = sst [smem:[#allocation17]] (%p2793_p5), %s2653_s27  ;;  %s2654_s29 = smov 1024  }
0x1409   : > { %2196 = sst [smem:[#allocation17 + $0x1]] (%p2793_p5), %s2654_s29  ;;  %s2655_s8 = smov 4  }
0x140a   : > { %2197 = sst [smem:[#allocation17 + $0x2]] (%p2793_p5), %s2655_s8  ;;  %s2656_s0 = smov 128  }
0x140b   : > { %2198 = sst [smem:[#allocation17 + $0x3]] (%p2793_p5), %s2656_s0  ;;  %s2657_s1 = smov 8  }
0x140c   : > { %2199 = sst [smem:[#allocation17 + $0x4]] (%p2793_p5), %s2656_s0  ;;  %s2658_s24 = smov [#allocation16]  }
0x140d   : > { %s1898_s23 = scalar_lea.hbm %s3318_s30, %s2169_s20  ;;  %2200 = sst [smem:[#allocation17 + $0x5]] (%p2793_p5), %s2657_s1 }
0x140e   : > { %s1911_s18 = sshll.u32 %s1898_s23, 4  ;;  %s2659_s17 = smov 0   ;;  %s1912_s18 = int_to_ptr.hbm [resolvable:$true] %s1911_s18 }
0x140f   : > { %2201 = dma.general (%p2793_p5), %s1910_s2, 1024, %s1912_s18, %s1874_s21, %s2658_s24, [#allocation17], %s2659_s17, 0  }
0x1410 PF: > { %s3319_s22 = sld [smem:[#allocation26_spill]] }
0x1411   : > { %s3320_s20 = sld [smem:[#allocation24_spill]] }
0x1416   : > { %p2242_p9 = scmp.ge.s32.totalorder %s3319_s22, 2 }
0x1417   : > { %s1939_s26 = sand.u32 1, %s3320_s20  }
0x1418   : > { %p2224_p10 = pnand %p2242_p9, %p2797_p6  ;;  %s1940_s30 = scalar_lea.sflag [#allocation4], %s1939_s26 }
0x141a   : > { %p2225_p11 = pneg %p2224_p10 }
0x141c   : > { %2609 = dma.done.wait (%p2225_p11), %s1940_s30, 16  }
0x141d   : > { %2611 = vsyncadd (%p2225_p11), %s1940_s30, 4294967280  ;;  %s1949_s23 = scalar_lea.sflag [#allocation15], %s1939_s26 }
0x141e   : > { %2613 = dma.done.wait (%p2225_p11), %s1949_s23, 1024  }
0x141f   : > { %2615 = vsyncadd (%p2225_p11), %s1949_s23, 4294966272  ;;  %s3322_s30 = sld [smem:[#allocation27_spill]]  ;;  %s3325_s27 = smov %s2622_s28 }
0x1420   : > { %s3323_s29 = sld [smem:[#allocation25_spill]] }
0x1421   : > { %s3324_s12 = sld [smem:[#allocation28_spill]] }
0x1425   : > { %p36_p5 = scmp.ge.s32.totalorder %s3322_s30, 4  }
0x1426   : > { %s3326_s28 = smov %s3323_s29 }
0x1427   : > { %s3327_s29 = smov %s3324_s12  ;;  %38 = sbr.rel (!%p36_p5) target bundleno = 17 (0x11), region = 189 }
0x142c   :  { %1955 = vsyncpa [#allocation3], 1 }
0x142d   :  { %1957 = vsyncpa [#allocation3 + $0x1], 1 }
0x142e   :  { %1958 = vsyncpa [#allocation6], 1 }
0x142f   :  { %1959 = vsyncpa [#allocation9], 1 }
0x1430   :  { %1960 = vsyncpa [#allocation12], 1 }
0x1431   :  { %1961 = vsyncpa [#allocation4], 1 }
0x1432   :  { %1963 = vsyncpa [#allocation4 + $0x1], 1 }
0x1433   :  { %1964 = vsyncpa [#allocation15], 1 }
0x1434   :  { %1966 = vsyncpa [#allocation15 + $0x1], 1 }

</bundles_post_ra>
